<compile_context>
chip_gen: v7x
topology: tpu7x:2x2x1
jax: 0.10.0
libtpu: 0.0.40
codegen_flags: <defaults>
</compile_context>

<pallas_src>
import jax
import jax.numpy as jnp
from jax import lax
from jax.experimental import pallas as pl
from jax.experimental.pallas import tpu as pltpu

EPS = 1e-5


def _make_kernel(H, wcmid, is_changed):
    f32 = jnp.float32

    def bn(y, r_ref, bcast_ref, g_row, b_row):
        # Single-pass batch stats: per-column sum / sum-of-squares, then one
        # rectangular (W*C, C) matmul to per-channel [mean; mean_sq], affine
        # coefficients computed in the tiny per-channel space, then one
        # (C, W*C) matmul broadcasting [scale; shift] back to every column.
        s = jnp.sum(y, axis=0, keepdims=True)
        ss = jnp.sum(y * y, axis=0, keepdims=True)
        stats = jnp.dot(jnp.concatenate([s, ss], axis=0), r_ref[...],
                        preferred_element_type=f32)                 # (2, C)
        mean = stats[0:1, :]
        var = stats[1:2, :] - mean * mean                           # biased (train) var
        scale_c = g_row * lax.rsqrt(var + EPS)
        shift_c = b_row - mean * scale_c
        aff = jnp.dot(jnp.concatenate([scale_c, shift_c], axis=0), bcast_ref[...],
                      preferred_element_type=f32)                   # (2, W*C)
        return y * aff[0:1, :] + aff[1:2, :]                        # fused affine

    def kernel(x_ref, w1k_ref, m2_ref, w3k_ref,
               rmid_ref, bmid_ref, rexp_ref, bexp_ref,
               pmid_ref, pexp_ref, *rest):
        if is_changed:
            wt_ref, out_ref = rest
        else:
            (out_ref,) = rest

        nh = x_ref.shape[0]
        x = x_ref[...]                                              # (N*H, W*Cin)

        # conv1 (1x1): conv bias dropped (it cancels exactly in train-mode BN).
        f1 = jnp.dot(x, w1k_ref[...], preferred_element_type=f32)
        f1 = jnp.maximum(
            bn(f1, rmid_ref, bmid_ref, pmid_ref[0:1, :], pmid_ref[1:2, :]), 0.0)

        # conv2 (3x3, pad=1): H halo via XLU sublane roll + boundary-row mask
        # (no NHxNH shift constants); W halo folded into the banded weights.
        h_idx = lax.broadcasted_iota(jnp.int32, (nh, wcmid), 0) % H
        up = jnp.where(h_idx == 0, 0.0, pltpu.roll(f1, 1, 0))            # row h-1
        dn = jnp.where(h_idx == H - 1, 0.0, pltpu.roll(f1, nh - 1, 0))   # row h+1
        f2 = (jnp.dot(up, m2_ref[0:wcmid, :], preferred_element_type=f32)
              + jnp.dot(f1, m2_ref[wcmid:2 * wcmid, :], preferred_element_type=f32)
              + jnp.dot(dn, m2_ref[2 * wcmid:3 * wcmid, :], preferred_element_type=f32))
        f2 = jnp.maximum(
            bn(f2, rmid_ref, bmid_ref, pmid_ref[2:3, :], pmid_ref[3:4, :]), 0.0)

        # conv3 (1x1 expansion) + bn3 (shortcut bias pre-folded into its shift).
        f3 = jnp.dot(f2, w3k_ref[...], preferred_element_type=f32)
        f3 = bn(f3, rexp_ref, bexp_ref, pexp_ref[0:1, :], pexp_ref[1:2, :])

        # 1x1 trans shortcut computed last so it is never live across conv2/3;
        # identity shortcut reads x straight from the input ref.
        if is_changed:
            sc = jnp.dot(x_ref[...], wt_ref[...], preferred_element_type=f32)
        else:
            sc = x_ref[...]
        out_ref[...] = jnp.maximum(f3 + sc, 0.0)

    return kernel


def bottleneck_pallas(x_nchw, params):
    (w1, b1, g1, be1, w2, b2, g2, be2, w3, b3, g3, be3, wt, bt) = params
    del b1, b2, b3   # conv biases preceding train-mode BN cancel exactly
    N, Cin, H, W = x_nchw.shape
    Cmid = w1.shape[1]
    Cexp = w3.shape[1]
    NH, NHW = N * H, N * H * W
    WCin, WCmid, WCexp = W * Cin, W * Cmid, W * Cexp
    f32 = jnp.float32
    is_changed = Cin != Cexp

    # NCHW -> lane-dense (N*H, W*Cin) activation slab (no jnp.pad anywhere).
    x2d = jnp.transpose(x_nchw, (0, 2, 3, 1)).reshape(NH, WCin).astype(f32)

    eye_w = jnp.eye(W, dtype=f32)
    k1 = jnp.kron(eye_w, w1.astype(f32))                      # (WCin, WCmid)
    k3 = jnp.kron(eye_w, w3.astype(f32))                      # (WCmid, WCexp)

    # conv2: per-kh block-banded (tri-diagonal in W) weights, stacked on rows.
    def band(w_kh):                                           # w_kh: (3, Cmid, Cmid)
        cols = []
        for wo in range(W):
            blk = jnp.zeros((WCmid, Cmid), f32)
            for kw in range(3):
                wi = wo + kw - 1
                if 0 <= wi < W:
                    blk = blk.at[wi * Cmid:(wi + 1) * Cmid, :].set(w_kh[kw])
            cols.append(blk)
        return jnp.concatenate(cols, axis=1)                  # (WCmid, WCmid)
    m2 = jnp.concatenate([band(w2[kh].astype(f32)) for kh in range(3)], axis=0)

    # Rectangular per-channel reduce (W*C, C) and broadcast (C, W*C) matrices;
    # replaces the old square (W*C)^2 averaging constants (16x less DMA/FLOPs).
    r_mid = jnp.kron(jnp.ones((W, 1), f32), jnp.eye(Cmid, dtype=f32)) / NHW
    b_mid = jnp.kron(jnp.ones((1, W), f32), jnp.eye(Cmid, dtype=f32))
    r_exp = jnp.kron(jnp.ones((W, 1), f32), jnp.eye(Cexp, dtype=f32)) / NHW
    b_exp = jnp.kron(jnp.ones((1, W), f32), jnp.eye(Cexp, dtype=f32))

    # Per-channel BN params packed into two tiny slabs; the shortcut bias bt
    # folds into bn3's shift (it adds straight into the residual).
    pmid = jnp.stack([g1, be1, g2, be2]).astype(f32)          # (4, Cmid)
    be3_eff = be3.astype(f32) + (bt.astype(f32) if is_changed else 0.0)
    pexp = jnp.stack([g3.astype(f32), be3_eff], axis=0)       # (2, Cexp)

    inputs = [x2d, k1, m2, k3, r_mid, b_mid, r_exp, b_exp, pmid, pexp]
    if is_changed:
        inputs.append(jnp.kron(eye_w, wt.astype(f32)))        # (WCin, WCexp)

    vmem = pl.BlockSpec(memory_space=pltpu.MemorySpace.VMEM)
    out2d = pl.pallas_call(
        _make_kernel(H, WCmid, is_changed),
        out_shape=jax.ShapeDtypeStruct((NH, WCexp), f32),
        in_specs=[vmem] * len(inputs),
        out_specs=vmem,
        compiler_params=pltpu.CompilerParams(vmem_limit_bytes=16 * 1024 * 1024),
    )(*inputs)

    out = out2d.reshape(N, H, W, Cexp)
    return jnp.transpose(out, (0, 3, 1, 2))                   # back to NCHW


def bottleneck_ref(x_nchw, params):
    """Pure-JAX reference of the PyTorch BottleNeck forward (NCHW in/out)."""
    (w1, b1, g1, be1, w2, b2, g2, be2, w3, b3, g3, be3, wt, bt) = params
    x = jnp.transpose(x_nchw, (0, 2, 3, 1)).astype(jnp.float32)
    Cin = x.shape[-1]
    Cexp = w3.shape[1]

    def conv1x1(a, w, b):
        return jnp.einsum('nhwc,cd->nhwd', a, w) + b

    def conv3x3(a, w, b):
        y = lax.conv_general_dilated(a, w, (1, 1), [(1, 1), (1, 1)],
                                     dimension_numbers=('NHWC', 'HWIO', 'NHWC'))
        return y + b

    def bn(y, g, b):
        m = y.mean(axis=(0, 1, 2), keepdims=True)
        v = ((y - m) ** 2).mean(axis=(0, 1, 2), keepdims=True)
        return (y - m) * lax.rsqrt(v + EPS) * g + b

    f = jnp.maximum(bn(conv1x1(x, w1, b1), g1, be1), 0.0)
    f = jnp.maximum(bn(conv3x3(f, w2, b2), g2, be2), 0.0)
    f = bn(conv1x1(f, w3, b3), g3, be3)
    sc = conv1x1(x, wt, bt) if Cin != Cexp else x
    y = jnp.maximum(f + sc, 0.0)
    return jnp.transpose(y, (0, 3, 1, 2))


def init_params(key, cin, cmid, cexp):
    ks = jax.random.split(key, 14)
    w1 = 0.2 * jax.random.normal(ks[0], (cin, cmid), jnp.float32)
    b1 = 0.05 * jax.random.normal(ks[1], (cmid,), jnp.float32)
    g1 = 1.0 + 0.1 * jax.random.normal(ks[2], (cmid,), jnp.float32)
    be1 = 0.05 * jax.random.normal(ks[3], (cmid,), jnp.float32)
    w2 = 0.2 * jax.random.normal(ks[4], (3, 3, cmid, cmid), jnp.float32)
    b2 = 0.05 * jax.random.normal(ks[5], (cmid,), jnp.float32)
    g2 = 1.0 + 0.1 * jax.random.normal(ks[6], (cmid,), jnp.float32)
    be2 = 0.05 * jax.random.normal(ks[7], (cmid,), jnp.float32)
    w3 = 0.2 * jax.random.normal(ks[8], (cmid, cexp), jnp.float32)
    b3 = 0.05 * jax.random.normal(ks[9], (cexp,), jnp.float32)
    g3 = 1.0 + 0.1 * jax.random.normal(ks[10], (cexp,), jnp.float32)
    be3 = 0.05 * jax.random.normal(ks[11], (cexp,), jnp.float32)
    wt = 0.2 * jax.random.normal(ks[12], (cin, cexp), jnp.float32)
    bt = 0.05 * jax.random.normal(ks[13], (cexp,), jnp.float32)
    return (w1, b1, g1, be1, w2, b2, g2, be2, w3, b3, g3, be3, wt, bt)


if __name__ == "__main__":
    key = jax.random.PRNGKey(0)
    kx, kp = jax.random.split(key)
    N, Cin, Cmid, dilation, H, W = 2, 4, 8, 4, 16, 16
    Cexp = Cmid * dilation                    # in_channels != out_channels*dilation
    x = jax.random.normal(kx, (N, Cin, H, W), jnp.float32)   # NCHW like PyTorch
    params = init_params(kp, Cin, Cmid, Cexp)

    out = jax.block_until_ready(bottleneck_pallas(x, params))
    ref = jax.block_until_ready(bottleneck_ref(x, params))

    err = float(jnp.max(jnp.abs(out - ref)))
    assert out.shape == (N, Cexp, H, W), out.shape
    assert err < 1e-3, f"max abs err {err}"
    print("KERNEL_OK")
</pallas_src>

<mosaic_0001>
module attributes {stable_mosaic.version = 11 : i64} {
  func.func @kernel(%arg0: memref<32x64xf32, #tpu.memory_space<vmem>>, %arg1: memref<64x128xf32, #tpu.memory_space<vmem>>, %arg2: memref<384x128xf32, #tpu.memory_space<vmem>>, %arg3: memref<128x512xf32, #tpu.memory_space<vmem>>, %arg4: memref<128x8xf32, #tpu.memory_space<vmem>>, %arg5: memref<8x128xf32, #tpu.memory_space<vmem>>, %arg6: memref<512x32xf32, #tpu.memory_space<vmem>>, %arg7: memref<32x512xf32, #tpu.memory_space<vmem>>, %arg8: memref<4x8xf32, #tpu.memory_space<vmem>>, %arg9: memref<2x32xf32, #tpu.memory_space<vmem>>, %arg10: memref<64x512xf32, #tpu.memory_space<vmem>>, %arg11: memref<32x512xf32, #tpu.memory_space<vmem>>) attributes {dimension_semantics = [], scalar_prefetch = 0 : i64, scratch_operands = 0 : i64, tpu.core_type = #tpu.core_type<tc>} {
    %c0 = arith.constant 0 : index
    %c0_0 = arith.constant 0 : index
    %0 = vector.load %arg0[%c0, %c0_0] : memref<32x64xf32, #tpu.memory_space<vmem>>, vector<32x64xf32>
    %c0_1 = arith.constant 0 : index
    %c0_2 = arith.constant 0 : index
    %1 = vector.load %arg1[%c0_1, %c0_2] : memref<64x128xf32, #tpu.memory_space<vmem>>, vector<64x128xf32>
    %cst = arith.constant dense<0.000000e+00> : vector<32x128xf32>
    %2 = tpu.matmul %0, %1, %cst {dimension_numbers = #tpu.dot_dimension_numbers<[1], [0], [0], [1], [0, 0, 1, 1], [], []>} : vector<32x64xf32>, vector<64x128xf32>, vector<32x128xf32> -> vector<32x128xf32>
    %c0_3 = arith.constant 0 : index
    %c0_4 = arith.constant 0 : index
    %3 = vector.load %arg8[%c0_3, %c0_4] : memref<4x8xf32, #tpu.memory_space<vmem>>, vector<1x8xf32>
    %c1 = arith.constant 1 : index
    %c0_5 = arith.constant 0 : index
    %4 = vector.load %arg8[%c1, %c0_5] : memref<4x8xf32, #tpu.memory_space<vmem>>, vector<1x8xf32>
    %cst_6 = arith.constant dense<0.000000e+00> : vector<128xf32>
    %5 = vector.multi_reduction <add>, %2, %cst_6 [0] : vector<32x128xf32> to vector<128xf32>
    %6 = vector.shape_cast %5 : vector<128xf32> to vector<1x128xf32>
    %7 = arith.mulf %2, %2 : vector<32x128xf32>
    %cst_7 = arith.constant dense<0.000000e+00> : vector<128xf32>
    %8 = vector.multi_reduction <add>, %7, %cst_7 [0] : vector<32x128xf32> to vector<128xf32>
    %9 = vector.shape_cast %8 : vector<128xf32> to vector<1x128xf32>
    %10 = tpu.concatenate %6, %9 in 0 : vector<1x128xf32>, vector<1x128xf32> -> vector<2x128xf32>
    %c0_8 = arith.constant 0 : index
    %c0_9 = arith.constant 0 : index
    %11 = vector.load %arg4[%c0_8, %c0_9] : memref<128x8xf32, #tpu.memory_space<vmem>>, vector<128x8xf32>
    %cst_10 = arith.constant dense<0.000000e+00> : vector<2x8xf32>
    %12 = tpu.matmul %10, %11, %cst_10 {dimension_numbers = #tpu.dot_dimension_numbers<[1], [0], [0], [1], [0, 0, 1, 1], [], []>} : vector<2x128xf32>, vector<128x8xf32>, vector<2x8xf32> -> vector<2x8xf32>
    %13 = vector.extract_strided_slice %12 {offsets = [0, 0], sizes = [1, 8], strides = [1, 1]} : vector<2x8xf32> to vector<1x8xf32>
    %14 = vector.extract_strided_slice %12 {offsets = [1, 0], sizes = [1, 8], strides = [1, 1]} : vector<2x8xf32> to vector<1x8xf32>
    %15 = arith.mulf %13, %13 : vector<1x8xf32>
    %16 = arith.subf %14, %15 : vector<1x8xf32>
    %cst_11 = arith.constant 9.99999974E-6 : f32
    %17 = vector.broadcast %cst_11 : f32 to vector<1x8xf32>
    %18 = arith.addf %16, %17 : vector<1x8xf32>
    %19 = math.rsqrt %18 : vector<1x8xf32>
    %20 = arith.mulf %3, %19 : vector<1x8xf32>
    %21 = arith.mulf %13, %20 : vector<1x8xf32>
    %22 = arith.subf %4, %21 : vector<1x8xf32>
    %23 = tpu.concatenate %20, %22 in 0 : vector<1x8xf32>, vector<1x8xf32> -> vector<2x8xf32>
    %c0_12 = arith.constant 0 : index
    %c0_13 = arith.constant 0 : index
    %24 = vector.load %arg5[%c0_12, %c0_13] : memref<8x128xf32, #tpu.memory_space<vmem>>, vector<8x128xf32>
    %cst_14 = arith.constant dense<0.000000e+00> : vector<2x128xf32>
    %25 = tpu.matmul %23, %24, %cst_14 {dimension_numbers = #tpu.dot_dimension_numbers<[1], [0], [0], [1], [0, 0, 1, 1], [], []>} : vector<2x8xf32>, vector<8x128xf32>, vector<2x128xf32> -> vector<2x128xf32>
    %26 = vector.extract_strided_slice %25 {offsets = [0, 0], sizes = [1, 128], strides = [1, 1]} : vector<2x128xf32> to vector<1x128xf32>
    %27 = vector.broadcast %26 : vector<1x128xf32> to vector<32x128xf32>
    %28 = arith.mulf %2, %27 : vector<32x128xf32>
    %29 = vector.extract_strided_slice %25 {offsets = [1, 0], sizes = [1, 128], strides = [1, 1]} : vector<2x128xf32> to vector<1x128xf32>
    %30 = vector.broadcast %29 : vector<1x128xf32> to vector<32x128xf32>
    %31 = arith.addf %28, %30 : vector<32x128xf32>
    %cst_15 = arith.constant 0.000000e+00 : f32
    %32 = vector.broadcast %cst_15 : f32 to vector<32x128xf32>
    %33 = arith.maximumf %31, %32 : vector<32x128xf32>
    %34 = tpu.iota {dimensions = array<i32: 0>} : vector<32x128xi32>
    %c16_i32 = arith.constant 16 : i32
    %c0_i32 = arith.constant 0 : i32
    %35 = arith.cmpi eq, %c16_i32, %c0_i32 : i32
    %c1_i32 = arith.constant 1 : i32
    %36 = arith.select %35, %c1_i32, %c16_i32 : i32
    %37 = vector.broadcast %36 : i32 to vector<32x128xi32>
    %38 = arith.remsi %34, %37 : vector<32x128xi32>
    %c0_i32_16 = arith.constant 0 : i32
    %39 = vector.broadcast %c0_i32_16 : i32 to vector<32x128xi32>
    %40 = arith.cmpi ne, %38, %39 : vector<32x128xi32>
    %c0_i32_17 = arith.constant 0 : i32
    %41 = vector.broadcast %c0_i32_17 : i32 to vector<32x128xi32>
    %42 = arith.cmpi slt, %38, %41 : vector<32x128xi32>
    %c0_i32_18 = arith.constant 0 : i32
    %43 = arith.cmpi slt, %36, %c0_i32_18 : i32
    %44 = vector.broadcast %43 : i1 to vector<32x128xi1>
    %45 = vector.broadcast %44 : vector<32x128xi1> to vector<32x128xi1>
    %46 = arith.xori %42, %45 : vector<32x128xi1>
    %47 = arith.andi %46, %40 : vector<32x128xi1>
    %48 = vector.broadcast %36 : i32 to vector<32x128xi32>
    %49 = arith.addi %38, %48 : vector<32x128xi32>
    %50 = arith.select %47, %49, %38 : vector<32x128xi1>, vector<32x128xi32>
    %c0_i32_19 = arith.constant 0 : i32
    %51 = vector.broadcast %c0_i32_19 : i32 to vector<32x128xi32>
    %52 = arith.cmpi eq, %50, %51 : vector<32x128xi32>
    %c1_i32_20 = arith.constant 1 : i32
    %53 = tpu.dynamic_rotate %33 by %c1_i32_20 dim 0 : vector<32x128xf32>, i32 -> vector<32x128xf32>
    %cst_21 = arith.constant 0.000000e+00 : f32
    %54 = vector.broadcast %cst_21 : f32 to vector<32x128xf32>
    %55 = arith.select %52, %54, %53 : vector<32x128xi1>, vector<32x128xf32>
    %c15_i32 = arith.constant 15 : i32
    %56 = vector.broadcast %c15_i32 : i32 to vector<32x128xi32>
    %57 = arith.cmpi eq, %50, %56 : vector<32x128xi32>
    %c31_i32 = arith.constant 31 : i32
    %58 = tpu.dynamic_rotate %33 by %c31_i32 dim 0 : vector<32x128xf32>, i32 -> vector<32x128xf32>
    %cst_22 = arith.constant 0.000000e+00 : f32
    %59 = vector.broadcast %cst_22 : f32 to vector<32x128xf32>
    %60 = arith.select %57, %59, %58 : vector<32x128xi1>, vector<32x128xf32>
    %c0_23 = arith.constant 0 : index
    %c0_24 = arith.constant 0 : index
    %61 = vector.load %arg2[%c0_23, %c0_24] : memref<384x128xf32, #tpu.memory_space<vmem>>, vector<128x128xf32>
    %cst_25 = arith.constant dense<0.000000e+00> : vector<32x128xf32>
    %62 = tpu.matmul %55, %61, %cst_25 {dimension_numbers = #tpu.dot_dimension_numbers<[1], [0], [0], [1], [0, 0, 1, 1], [], []>} : vector<32x128xf32>, vector<128x128xf32>, vector<32x128xf32> -> vector<32x128xf32>
    %c128 = arith.constant 128 : index
    %c0_26 = arith.constant 0 : index
    %63 = vector.load %arg2[%c128, %c0_26] : memref<384x128xf32, #tpu.memory_space<vmem>>, vector<128x128xf32>
    %cst_27 = arith.constant dense<0.000000e+00> : vector<32x128xf32>
    %64 = tpu.matmul %33, %63, %cst_27 {dimension_numbers = #tpu.dot_dimension_numbers<[1], [0], [0], [1], [0, 0, 1, 1], [], []>} : vector<32x128xf32>, vector<128x128xf32>, vector<32x128xf32> -> vector<32x128xf32>
    %65 = arith.addf %62, %64 : vector<32x128xf32>
    %c256 = arith.constant 256 : index
    %c0_28 = arith.constant 0 : index
    %66 = vector.load %arg2[%c256, %c0_28] : memref<384x128xf32, #tpu.memory_space<vmem>>, vector<128x128xf32>
    %cst_29 = arith.constant dense<0.000000e+00> : vector<32x128xf32>
    %67 = tpu.matmul %60, %66, %cst_29 {dimension_numbers = #tpu.dot_dimension_numbers<[1], [0], [0], [1], [0, 0, 1, 1], [], []>} : vector<32x128xf32>, vector<128x128xf32>, vector<32x128xf32> -> vector<32x128xf32>
    %68 = arith.addf %65, %67 : vector<32x128xf32>
    %c2 = arith.constant 2 : index
    %c0_30 = arith.constant 0 : index
    %69 = vector.load %arg8[%c2, %c0_30] : memref<4x8xf32, #tpu.memory_space<vmem>>, vector<1x8xf32>
    %c3 = arith.constant 3 : index
    %c0_31 = arith.constant 0 : index
    %70 = vector.load %arg8[%c3, %c0_31] : memref<4x8xf32, #tpu.memory_space<vmem>>, vector<1x8xf32>
    %cst_32 = arith.constant dense<0.000000e+00> : vector<128xf32>
    %71 = vector.multi_reduction <add>, %68, %cst_32 [0] : vector<32x128xf32> to vector<128xf32>
    %72 = vector.shape_cast %71 : vector<128xf32> to vector<1x128xf32>
    %73 = arith.mulf %68, %68 : vector<32x128xf32>
    %cst_33 = arith.constant dense<0.000000e+00> : vector<128xf32>
    %74 = vector.multi_reduction <add>, %73, %cst_33 [0] : vector<32x128xf32> to vector<128xf32>
    %75 = vector.shape_cast %74 : vector<128xf32> to vector<1x128xf32>
    %76 = tpu.concatenate %72, %75 in 0 : vector<1x128xf32>, vector<1x128xf32> -> vector<2x128xf32>
    %c0_34 = arith.constant 0 : index
    %c0_35 = arith.constant 0 : index
    %77 = vector.load %arg4[%c0_34, %c0_35] : memref<128x8xf32, #tpu.memory_space<vmem>>, vector<128x8xf32>
    %cst_36 = arith.constant dense<0.000000e+00> : vector<2x8xf32>
    %78 = tpu.matmul %76, %77, %cst_36 {dimension_numbers = #tpu.dot_dimension_numbers<[1], [0], [0], [1], [0, 0, 1, 1], [], []>} : vector<2x128xf32>, vector<128x8xf32>, vector<2x8xf32> -> vector<2x8xf32>
    %79 = vector.extract_strided_slice %78 {offsets = [0, 0], sizes = [1, 8], strides = [1, 1]} : vector<2x8xf32> to vector<1x8xf32>
    %80 = vector.extract_strided_slice %78 {offsets = [1, 0], sizes = [1, 8], strides = [1, 1]} : vector<2x8xf32> to vector<1x8xf32>
    %81 = arith.mulf %79, %79 : vector<1x8xf32>
    %82 = arith.subf %80, %81 : vector<1x8xf32>
    %cst_37 = arith.constant 9.99999974E-6 : f32
    %83 = vector.broadcast %cst_37 : f32 to vector<1x8xf32>
    %84 = arith.addf %82, %83 : vector<1x8xf32>
    %85 = math.rsqrt %84 : vector<1x8xf32>
    %86 = arith.mulf %69, %85 : vector<1x8xf32>
    %87 = arith.mulf %79, %86 : vector<1x8xf32>
    %88 = arith.subf %70, %87 : vector<1x8xf32>
    %89 = tpu.concatenate %86, %88 in 0 : vector<1x8xf32>, vector<1x8xf32> -> vector<2x8xf32>
    %c0_38 = arith.constant 0 : index
    %c0_39 = arith.constant 0 : index
    %90 = vector.load %arg5[%c0_38, %c0_39] : memref<8x128xf32, #tpu.memory_space<vmem>>, vector<8x128xf32>
    %cst_40 = arith.constant dense<0.000000e+00> : vector<2x128xf32>
    %91 = tpu.matmul %89, %90, %cst_40 {dimension_numbers = #tpu.dot_dimension_numbers<[1], [0], [0], [1], [0, 0, 1, 1], [], []>} : vector<2x8xf32>, vector<8x128xf32>, vector<2x128xf32> -> vector<2x128xf32>
    %92 = vector.extract_strided_slice %91 {offsets = [0, 0], sizes = [1, 128], strides = [1, 1]} : vector<2x128xf32> to vector<1x128xf32>
    %93 = vector.broadcast %92 : vector<1x128xf32> to vector<32x128xf32>
    %94 = arith.mulf %68, %93 : vector<32x128xf32>
    %95 = vector.extract_strided_slice %91 {offsets = [1, 0], sizes = [1, 128], strides = [1, 1]} : vector<2x128xf32> to vector<1x128xf32>
    %96 = vector.broadcast %95 : vector<1x128xf32> to vector<32x128xf32>
    %97 = arith.addf %94, %96 : vector<32x128xf32>
    %cst_41 = arith.constant 0.000000e+00 : f32
    %98 = vector.broadcast %cst_41 : f32 to vector<32x128xf32>
    %99 = arith.maximumf %97, %98 : vector<32x128xf32>
    %c0_42 = arith.constant 0 : index
    %c0_43 = arith.constant 0 : index
    %100 = vector.load %arg3[%c0_42, %c0_43] : memref<128x512xf32, #tpu.memory_space<vmem>>, vector<128x512xf32>
    %cst_44 = arith.constant dense<0.000000e+00> : vector<32x512xf32>
    %101 = tpu.matmul %99, %100, %cst_44 {dimension_numbers = #tpu.dot_dimension_numbers<[1], [0], [0], [1], [0, 0, 1, 1], [], []>} : vector<32x128xf32>, vector<128x512xf32>, vector<32x512xf32> -> vector<32x512xf32>
    %c0_45 = arith.constant 0 : index
    %c0_46 = arith.constant 0 : index
    %102 = vector.load %arg9[%c0_45, %c0_46] : memref<2x32xf32, #tpu.memory_space<vmem>>, vector<1x32xf32>
    %c1_47 = arith.constant 1 : index
    %c0_48 = arith.constant 0 : index
    %103 = vector.load %arg9[%c1_47, %c0_48] : memref<2x32xf32, #tpu.memory_space<vmem>>, vector<1x32xf32>
    %cst_49 = arith.constant dense<0.000000e+00> : vector<512xf32>
    %104 = vector.multi_reduction <add>, %101, %cst_49 [0] : vector<32x512xf32> to vector<512xf32>
    %105 = vector.shape_cast %104 : vector<512xf32> to vector<1x512xf32>
    %106 = arith.mulf %101, %101 : vector<32x512xf32>
    %cst_50 = arith.constant dense<0.000000e+00> : vector<512xf32>
    %107 = vector.multi_reduction <add>, %106, %cst_50 [0] : vector<32x512xf32> to vector<512xf32>
    %108 = vector.shape_cast %107 : vector<512xf32> to vector<1x512xf32>
    %109 = tpu.concatenate %105, %108 in 0 : vector<1x512xf32>, vector<1x512xf32> -> vector<2x512xf32>
    %c0_51 = arith.constant 0 : index
    %c0_52 = arith.constant 0 : index
    %110 = vector.load %arg6[%c0_51, %c0_52] : memref<512x32xf32, #tpu.memory_space<vmem>>, vector<512x32xf32>
    %cst_53 = arith.constant dense<0.000000e+00> : vector<2x32xf32>
    %111 = tpu.matmul %109, %110, %cst_53 {dimension_numbers = #tpu.dot_dimension_numbers<[1], [0], [0], [1], [0, 0, 1, 1], [], []>} : vector<2x512xf32>, vector<512x32xf32>, vector<2x32xf32> -> vector<2x32xf32>
    %112 = vector.extract_strided_slice %111 {offsets = [0, 0], sizes = [1, 32], strides = [1, 1]} : vector<2x32xf32> to vector<1x32xf32>
    %113 = vector.extract_strided_slice %111 {offsets = [1, 0], sizes = [1, 32], strides = [1, 1]} : vector<2x32xf32> to vector<1x32xf32>
    %114 = arith.mulf %112, %112 : vector<1x32xf32>
    %115 = arith.subf %113, %114 : vector<1x32xf32>
    %cst_54 = arith.constant 9.99999974E-6 : f32
    %116 = vector.broadcast %cst_54 : f32 to vector<1x32xf32>
    %117 = arith.addf %115, %116 : vector<1x32xf32>
    %118 = math.rsqrt %117 : vector<1x32xf32>
    %119 = arith.mulf %102, %118 : vector<1x32xf32>
    %120 = arith.mulf %112, %119 : vector<1x32xf32>
    %121 = arith.subf %103, %120 : vector<1x32xf32>
    %122 = tpu.concatenate %119, %121 in 0 : vector<1x32xf32>, vector<1x32xf32> -> vector<2x32xf32>
    %c0_55 = arith.constant 0 : index
    %c0_56 = arith.constant 0 : index
    %123 = vector.load %arg7[%c0_55, %c0_56] : memref<32x512xf32, #tpu.memory_space<vmem>>, vector<32x512xf32>
    %cst_57 = arith.constant dense<0.000000e+00> : vector<2x512xf32>
    %124 = tpu.matmul %122, %123, %cst_57 {dimension_numbers = #tpu.dot_dimension_numbers<[1], [0], [0], [1], [0, 0, 1, 1], [], []>} : vector<2x32xf32>, vector<32x512xf32>, vector<2x512xf32> -> vector<2x512xf32>
    %125 = vector.extract_strided_slice %124 {offsets = [0, 0], sizes = [1, 512], strides = [1, 1]} : vector<2x512xf32> to vector<1x512xf32>
    %126 = vector.broadcast %125 : vector<1x512xf32> to vector<32x512xf32>
    %127 = arith.mulf %101, %126 : vector<32x512xf32>
    %128 = vector.extract_strided_slice %124 {offsets = [1, 0], sizes = [1, 512], strides = [1, 1]} : vector<2x512xf32> to vector<1x512xf32>
    %129 = vector.broadcast %128 : vector<1x512xf32> to vector<32x512xf32>
    %130 = arith.addf %127, %129 : vector<32x512xf32>
    %c0_58 = arith.constant 0 : index
    %c0_59 = arith.constant 0 : index
    %131 = vector.load %arg0[%c0_58, %c0_59] : memref<32x64xf32, #tpu.memory_space<vmem>>, vector<32x64xf32>
    %c0_60 = arith.constant 0 : index
    %c0_61 = arith.constant 0 : index
    %132 = vector.load %arg10[%c0_60, %c0_61] : memref<64x512xf32, #tpu.memory_space<vmem>>, vector<64x512xf32>
    %cst_62 = arith.constant dense<0.000000e+00> : vector<32x512xf32>
    %133 = tpu.matmul %131, %132, %cst_62 {dimension_numbers = #tpu.dot_dimension_numbers<[1], [0], [0], [1], [0, 0, 1, 1], [], []>} : vector<32x64xf32>, vector<64x512xf32>, vector<32x512xf32> -> vector<32x512xf32>
    %134 = arith.addf %130, %133 : vector<32x512xf32>
    %cst_63 = arith.constant 0.000000e+00 : f32
    %135 = vector.broadcast %cst_63 : f32 to vector<32x512xf32>
    %136 = arith.maximumf %134, %135 : vector<32x512xf32>
    %c0_64 = arith.constant 0 : index
    %c0_65 = arith.constant 0 : index
    %137 = vector.load %arg11[%c0_64, %c0_65] : memref<32x512xf32, #tpu.memory_space<vmem>>, vector<32x512xf32>
    tpu.vector_store %arg11[%c0_64, %c0_65], %136 {strides = array<i32>} : memref<32x512xf32, #tpu.memory_space<vmem>>, vector<32x512xf32>,
    return
  }
}

</mosaic_0001>

<bundles_post_ra>
// kernel: tpu_custom_call.1
= control target key start
LH: loop header
LB: loop body
LE: loop exit
PB: predicated region body
PF: predicated region fallthrough
CT: control target
= control target key end

     0   :  { %16 = vsyncpa [#allocation3], 0  ;;  %s4021_s0 = inlined_call_operand.hbm [shape: f32[32,64], index: 0, kind: input, shape index: {}]   ;;  %s4022_s1 = inlined_call_operand.hbm [shape: f32[64,128], index: 1, kind: input, shape index: {}]   ;;  %s4023_s2 = inlined_call_operand.hbm [shape: f32[384,128], index: 2, kind: input, shape index: {}]   ;;  %s4024_s3 = inlined_call_operand.vmem [shape: f32[128,512], index: 3, kind: input, shape index: {}]   ;;  %s4025_s4 = inlined_call_operand.vmem [shape: f32[128,8], index: 4, kind: input, shape index: {}]   ;;  %s4026_s5 = inlined_call_operand.vmem [shape: f32[8,128], index: 5, kind: input, shape index: {}]   ;;  %s4027_s6 = inlined_call_operand.vmem [shape: f32[512,32], index: 6, kind: input, shape index: {}]   ;;  %s4028_s7 = inlined_call_operand.hbm [shape: f32[32,512], index: 7, kind: input, shape index: {}]   ;;  %s4029_s8 = inlined_call_operand.vmem [shape: f32[4,8], index: 8, kind: input, shape index: {}]   ;;  %s4030_s9 = inlined_call_operand.vmem [shape: f32[2,32], index: 9, kind: input, shape index: {}]   ;;  %s4031_s10 = inlined_call_operand.vmem [shape: f32[64,512], index: 10, kind: input, shape index: {}]   ;;  %s4032_s11 = inlined_call_operand.hbm [shape: f32[32,512], index: 11, kind: output, shape index: {}]  }
   0x1   :  { %17 = vsyncpa [#allocation6], 0 }
   0x2   :  { %18 = vsyncpa [#allocation9], 0 }
   0x3   :  { %19 = vsyncpa [#allocation4], 0  ;;  %s2995_s17 = smov [#allocation5]   ;;  %s2996_s19 = smov [#allocation2]  }
   0x4   :  { %s37_s18 = sshll.u32 %s2995_s17, 4  ;;  %s25_s20 = sshll.u32 %s2996_s19, 4  ;;  %s38_s18 = int_to_ptr.vmem [resolvable:$true] %s37_s18  ;;  %s3067_s20 = int_to_ptr.vmem [resolvable:$true] %s25_s20 }
   0x5   :  { %s2877_s23 = scalar_lea.hbm %s4022_s1, 1024 }
   0x6   :  { %p2878_p0 = scmp.ne.s32.totalorder %s4022_s1, %s2877_s23  ;;  %p2881_p1 = scmp.lt.u32.totalorder %s2877_s23, %s4022_s1 }
   0x8   :  { %p2883_p2 = pnand %p2881_p1, %p2878_p0 }
   0xa   :  { %2886 = shalt.err (!%p2883_p2)
}
   0xb   :  { %s2887_s28 = scalar_lea.vmem %s38_s18, 1024  ;;  %p2892_p4 = scmp.lt.s32.totalorder %s38_s18, %s38_s18 }
   0xc   :  { %p2888_p3 = scmp.ne.s32.totalorder %s38_s18, %s2887_s28  ;;  %p2893_p5 = scmp.lt.s32.totalorder %s2887_s28, %s2887_s28 }
   0xe   :  { %p2894_p6 = por %p2893_p5, %p2892_p4 }
  0x10   :  { %p2895_p7 = pnand %p2894_p6, %p2888_p3 }
  0x12   :  { %2898 = shalt.err (!%p2895_p7)
}
  0x13   :  { %s2997_s29 = smov 128   ;;  %s2998_s30 = smov 8  }
  0x14   :  { %43 = dma.hbm_to_vmem [thread:$0]  %s4022_s1, 1024, %s38_s18, [#allocation6], %s2997_s29, %s2997_s29, %s2998_s30  }
  0x15   :  { %s2899_s16 = scalar_lea.hbm %s4021_s0, 512 }
  0x16   :  { %p2900_p8 = scmp.ne.s32.totalorder %s4021_s0, %s2899_s16  ;;  %p2903_p9 = scmp.lt.u32.totalorder %s2899_s16, %s4021_s0 }
  0x18   :  { %p2905_p10 = pnand %p2903_p9, %p2900_p8 }
  0x1a   :  { %2908 = shalt.err (!%p2905_p10)
}
  0x1b   :  { %s2909_s23 = scalar_lea.vmem %s3067_s20, 512  ;;  %p2914_p12 = scmp.lt.s32.totalorder %s3067_s20, %s3067_s20 }
  0x1c   :  { %p2910_p11 = scmp.ne.s32.totalorder %s3067_s20, %s2909_s23  ;;  %p2915_p13 = scmp.lt.s32.totalorder %s2909_s23, %s2909_s23 }
  0x1e   :  { %p2916_p0 = por %p2915_p13, %p2914_p12 }
  0x20   :  { %p2917_p1 = pnand %p2916_p0, %p2910_p11 }
  0x22   :  { %2920 = shalt.err (!%p2917_p1)
}
  0x23   :  { %31 = dma.hbm_to_vmem [thread:$0]  %s4021_s0, 512, %s3067_s20, [#allocation3], %s2997_s29, %s2997_s29, %s2998_s30  }
  0x24   :  { %s2999_s24 = smov [#allocation7]   ;;  %s3000_s26 = smov [#allocation8]  }
  0x25   :  { %s49_s25 = sshll.u32 %s2999_s24, 4  ;;  %s69_s27 = sshll.u32 %s3000_s26, 4  ;;  %s50_s25 = int_to_ptr.vmem [resolvable:$true] %s49_s25  ;;  %s3104_s27 = int_to_ptr.vmem [resolvable:$true] %s69_s27 }
  0x26   :  { %s2921_s13 = scalar_lea.hbm %s4023_s2, 6144 }
  0x27   :  { %p2922_p2 = scmp.ne.s32.totalorder %s4023_s2, %s2921_s13  ;;  %p2925_p3 = scmp.lt.u32.totalorder %s2921_s13, %s4023_s2 }
  0x29   :  { %p2927_p4 = pnand %p2925_p3, %p2922_p2 }
  0x2b   :  { %2930 = shalt.err (!%p2927_p4)
}
  0x2c   :  { %s2931_s0 = scalar_lea.vmem %s50_s25, 6144  ;;  %p2936_p6 = scmp.lt.s32.totalorder %s50_s25, %s50_s25 }
  0x2d   :  { %p2932_p5 = scmp.ne.s32.totalorder %s50_s25, %s2931_s0  ;;  %p2937_p7 = scmp.lt.s32.totalorder %s2931_s0, %s2931_s0 }
  0x2f   :  { %p2938_p8 = por %p2937_p7, %p2936_p6 }
  0x31   :  { %p2939_p9 = pnand %p2938_p8, %p2932_p5 }
  0x33   :  { %2942 = shalt.err (!%p2939_p9)
}
  0x34   :  { %55 = dma.hbm_to_vmem [thread:$0]  %s4023_s2, 6144, %s50_s25, [#allocation6], %s2997_s29, %s2997_s29, %s2998_s30  }
  0x35   :  { %s2943_s23 = scalar_lea.hbm %s4028_s7, 2048 }
  0x36   :  { %p2944_p10 = scmp.ne.s32.totalorder %s4028_s7, %s2943_s23  ;;  %p2947_p11 = scmp.lt.u32.totalorder %s2943_s23, %s4028_s7 }
  0x38   :  { %p2949_p12 = pnand %p2947_p11, %p2944_p10 }
  0x3a   :  { %2952 = shalt.err (!%p2949_p12)
}
  0x3b   :  { %s2953_s28 = scalar_lea.vmem %s3104_s27, 2048  ;;  %p2958_p0 = scmp.lt.s32.totalorder %s3104_s27, %s3104_s27 }
  0x3c   :  { %p2954_p13 = scmp.ne.s32.totalorder %s3104_s27, %s2953_s28  ;;  %p2959_p1 = scmp.lt.s32.totalorder %s2953_s28, %s2953_s28 }
  0x3e   :  { %p2960_p2 = por %p2959_p1, %p2958_p0 }
  0x40   :  { %p2961_p3 = pnand %p2960_p2, %p2954_p13 }
  0x42   :  { %2964 = shalt.err (!%p2961_p3)
}
  0x43   :  { %s3001_s2 = smov 512   ;;  %s3002_s29 = smov 32  }
  0x44   :  { %75 = dma.hbm_to_vmem [thread:$0]  %s4028_s7, 2048, %s3104_s27, [#allocation9], %s3001_s2, %s3001_s2, %s3002_s29  }
  0x45   :  { %2987 = dma.done.wait [#allocation3], 512  }
  0x46   :  { %2988 = vsyncadd [#allocation3], 4294966784 }
  0x47   :  { %2989 = dma.done.wait [#allocation6], 7168  }
  0x48   :  { %2990 = vsyncadd [#allocation6], 4294960128 }
  0x49   :  { %2991 = dma.done.wait [#allocation9], 2048  }
  0x4a   :  { %2992 = vsyncadd [#allocation9], 4294965248  ;;  %v3003_v0 = vmov 0.0|0.0   ;;  %v98_v1 = vld [vmem:[#allocation5] sm:$0xff]  ;;  %v99_v2 = vld [vmem:[#allocation5 + $0x8] sm:$0xff]  ;;  %vm106_vm0 = vcmask 523264  }
  0x4b   :  { %2527 = vmatprep.subr.bf16.mxu1 %v3003_v0  ;;  %v100_v3 = vld [vmem:[#allocation5 + $0x10] sm:$0xff]  ;;  %v2511_v4 = vpack.c.bf16 %v99_v2, %v98_v1  ;;  %v101_v5 = vld [vmem:[#allocation5 + $0x18] sm:$0xff]  ;;  %v102_v7 = vld [vmem:[#allocation5 + $0x20] sm:$0xff]  ;;  %vm3004_vm1 = vmmov 0   ;;  %v3005_v40 = vmov 0.0   ;;  %vm228_vm2 = vcmask 1040384  }
  0x4c   :  { %v2515_v6 = vpack.c.bf16 %v101_v5, %v100_v3  ;;  %v103_v8 = vld [vmem:[#allocation5 + $0x28] sm:$0xff]  ;;  %v94_v9 = vld [vmem:[#allocation2] sm:$0xff]  ;;  %v232_v12 = vld [vmem:[%s4025_s4 + $0x10] sm:$0xff]  ;;  %2349 = vmatprep.mubr.msk.f32.mxu1 %vm3004_vm1, %v3005_v40  ;;  %vm334_vm3 = vcmask 64512   ;;  %vm1600_vm10 = vcmask 261120  }
  0x4d   :  { %2512 = vmatprep.subr.bf16.mxu0 %v2511_v4  ;;  %2311 = vmatprep.mubr.msk.f32.mxu0 %vm106_vm0, %v94_v9  ;;  %v230_v10 = vld [vmem:[%s4025_s4] sm:$0xff]  ;;  %v231_v11 = vld [vmem:[%s4025_s4 + $0x8] sm:$0xff]  ;;  %v2519_v13 = vpack.c.bf16 %v103_v8, %v102_v7  ;;  %v233_v15 = vld [vmem:[%s4025_s4 + $0x18] sm:$0xff] }
  0x4e   :  { %2514 = vmatpush3.bf16.msra.mxu0 %v2511_v4  ;;  %v3152_v14 = vpack.c.bf16 %v231_v11, %v230_v10  ;;  %v104_v16 = vld [vmem:[#allocation5 + $0x30] sm:$0xff]  ;;  %v105_v17 = vld [vmem:[#allocation5 + $0x38] sm:$0xff]  ;;  %v3158_v18 = vpack.c.bf16 %v233_v15, %v232_v12  ;;  %v95_v20 = vld [vmem:[#allocation2 + $0x8] sm:$0xff] }
  0x4f   :  { %2516 = vmatprep.subr.bf16.mxu0 %v2515_v6  ;;  %v2523_v19 = vpack.c.bf16 %v105_v17, %v104_v16  ;;  %v96_v21 = vld [vmem:[#allocation2 + $0x10] sm:$0xff]  ;;  %v97_v22 = vld [vmem:[#allocation2 + $0x18] sm:$0xff]  ;;  %v234_v23 = vld [vmem:[%s4025_s4 + $0x20] sm:$0xff] }
  0x50   :  { %2529 = vmatpush3.bf16.msra.mxu1 %v3152_v14  ;;  %v235_v24 = vld [vmem:[%s4025_s4 + $0x28] sm:$0xff]  ;;  %v236_v26 = vld [vmem:[%s4025_s4 + $0x30] sm:$0xff]  ;;  %v237_v27 = vld [vmem:[%s4025_s4 + $0x38] sm:$0xff] }
  0x51   :  { %2530 = vmatprep.subr.bf16.mxu1 %v3003_v0  ;;  %v3172_v25 = vpack.c.bf16 %v235_v24, %v234_v23  ;;  %v3182_v28 = vpack.c.bf16 %v237_v27, %v236_v26  ;;  %v238_v29 = vld [vmem:[%s4025_s4 + $0x40] sm:$0xff]  ;;  %v239_v30 = vld [vmem:[%s4025_s4 + $0x48] sm:$0xff]  ;;  %v240_v32 = vld [vmem:[%s4025_s4 + $0x50] sm:$0xff] }
  0x52   :  { %2518 = vmatpush3.bf16.msra.mxu0 %v2515_v6  ;;  %v2540_v31 = vpack.c.bf16 %v239_v30, %v238_v29  ;;  %v241_v33 = vld [vmem:[%s4025_s4 + $0x58] sm:$0xff]  ;;  %v242_v35 = vld [vmem:[%s4025_s4 + $0x60] sm:$0xff]  ;;  %v243_v36 = vld [vmem:[%s4025_s4 + $0x68] sm:$0xff] }
  0x53   :  { %2520 = vmatprep.subr.bf16.mxu0 %v2519_v13  ;;  %v2543_v34 = vpack.c.bf16 %v241_v33, %v240_v32  ;;  %v2546_v37 = vpack.c.bf16 %v243_v36, %v242_v35  ;;  %v244_v38 = vld [vmem:[%s4025_s4 + $0x70] sm:$0xff]  ;;  %v245_v39 = vld [vmem:[%s4025_s4 + $0x78] sm:$0xff]  ;;  %v3257_v6 = vld [vmem:[%s4026_s5] sm:$0xff] }
  0x54   :  { %2532 = vmatpush3.bf16.msra.mxu1 %v3158_v18  ;;  %v2549_v41 = vpack.c.bf16 %v245_v39, %v244_v38  ;;  %v531_v7 = vld [vmem:[#allocation7 + $0x80] sm:$0xff]  ;;  %v532_v8 = vld [vmem:[#allocation7 + $0x88] sm:$0xff]  ;;  %v534_v23 = vld [vmem:[#allocation7 + $0x98] sm:$0xff] }
  0x55   :  { %2533 = vmatprep.subr.bf16.mxu1 %v3003_v0  ;;  %v2551_v9 = vpack.c.bf16 %v532_v8, %v531_v7  ;;  %v204_v16 = vld [vmem:[%s4029_s8] sm:$0x1]  ;;  %v537_v30 = vld [vmem:[#allocation7 + $0xb0] sm:$0xff]  ;;  %v518_v7 = vld [vmem:[#allocation7 + $0x18] sm:$0xff] }
  0x56   :  { %2522 = vmatpush3.bf16.msra.mxu0 %v2519_v13  ;;  %v535_v27 = vld [vmem:[#allocation7 + $0xa0] sm:$0xff]  ;;  %v541_v36 = vld [vmem:[#allocation7 + $0xd0] sm:$0xff] }
  0x57   :  { %2524 = vmatprep.subr.bf16.mxu0 %v2523_v19  ;;  %v539_v33 = vld [vmem:[#allocation7 + $0xc0] sm:$0xff] }
  0x58   :  { %2535 = vmatpush3.bf16.msra.mxu1 %v3172_v25  ;;  %v543_v39 = vld [vmem:[#allocation7 + $0xe0] sm:$0xff] }
  0x59   :  { %2536 = vmatprep.subr.bf16.mxu1 %v3003_v0 }
  0x5a   :  { %2526 = vmatpush3.bf16.msra.mxu0 %v2523_v19  ;;  %v205_v19 = vld [vmem:[%s4029_s8 + $0x1] sm:$0x1] }
  0x5b   :  { %2352 = vmatprep.subr.mxu0 %v3005_v40 }
  0x5c   :  { %2538 = vmatpush3.bf16.msra.mxu1 %v3182_v28 }
  0x5d   :  { %2312 = vmatmul.mubr.msk.f32.vlgmr.msra.gmra.mrb[0].mxu0 %vm106_vm0, %v95_v20  ;;  %2539 = vmatprep.subr.bf16.mxu1 %v3003_v0 }
  0x5e   :  { %2314 = vmatprep.mubr.msk.f32.mxu0 %vm106_vm0, %v96_v21  ;;  %2353 = vmatpush3.msra.mxu0 %v3257_v6 }
  0x5f   :  { %2552 = vmatprep.subr.bf16.mxu0 %v2551_v9 }
  0x60   :  { %2541 = vmatpush3.bf16.msra.mxu1 %v2540_v31 }
  0x61   :  { %2315 = vmatmul.mubr.msk.f32.gmra.mrb[2].mxu0 %vm106_vm0, %v97_v22  ;;  %2542 = vmatprep.subr.bf16.mxu1 %v3003_v0  ;;  %v533_v22 = vld [vmem:[#allocation7 + $0x90] sm:$0xff] }
  0x62   :  { %2354 = vmatprep.mubr.msk.f32.mxu0 %vm3004_vm1, %v3005_v40 }
  0x64   :  { %2544 = vmatpush3.bf16.msra.mxu1 %v2543_v34 }
  0x65   :  { %2545 = vmatprep.subr.bf16.mxu1 %v3003_v0 }
  0x68   :  { %2547 = vmatpush3.bf16.msra.mxu1 %v2546_v37 }
  0x69   :  { %2548 = vmatprep.subr.bf16.mxu1 %v3003_v0 }
  0x6c   :  { %2550 = vmatpush3.bf16.msra.mxu1 %v2549_v41 }
  0x6d   :  { %2647 = vmatprep.subr.bf16.mxu1 %v3003_v0 }
 0x130   :  { %v3219_v42 = vpop.f32.mrb[0].mxu0 }
 0x131   :  { %v216_v43 = vmul.f32 %v3219_v42, %v3219_v42  ;;  %v3223_v44 = vpop.f32.mrb[1].mxu0 }
 0x132   :  { %v206_v45 = vadd.f32 %v3219_v42, %v3223_v44  ;;  %v215_v46 = vmul.f32 %v3223_v44, %v3223_v44 }
 0x134   :  { %v219_v47 = vadd.f32 %v216_v43, %v215_v46  ;;  %v3229_v48 = vpop.f32.mrb[2].mxu0  ;;  %v546_v46 = vld [vmem:[#allocation7 + $0xf8] sm:$0xff] }
 0x135   :  { %v3231_v49 = vpop.f32.mrb[3].mxu0  ;;  %v218_v52 = vmul.f32 %v3229_v48, %v3229_v48 }
 0x136   :  { %v207_v50 = vadd.f32 %v206_v45, %v3231_v49  ;;  %v217_v51 = vmul.f32 %v3231_v49, %v3231_v49  ;;  %v545_v45 = vld [vmem:[#allocation7 + $0xf0] sm:$0xff] }
 0x138   :  { %v208_v53 = vadd.f32 %v3229_v48, %v207_v50  ;;  %v220_v54 = vadd.f32 %v219_v47, %v217_v51  ;;  %v2579_v47 = vpack.c.bf16 %v546_v46, %v545_v45  ;;  %v515_v50 = vld [vmem:[#allocation7] sm:$0xff]  ;;  %v516_v51 = vld [vmem:[#allocation7 + $0x8] sm:$0xff]  ;;  %v530_v45 = vld [vmem:[#allocation7 + $0x78] sm:$0xff] }
 0x13a   :  { %v209_v55 = vrot.slane %v208_v53, 4  ;;  %v221_v56 = vadd.f32 %v220_v54, %v218_v52  ;;  %v2583_v52 = vpack.c.bf16 %v516_v51, %v515_v50  ;;  %v717_v50 = vld [vmem:[#allocation7 + $0x100] sm:$0xff]  ;;  %v718_v51 = vld [vmem:[#allocation7 + $0x108] sm:$0xff] }
 0x13c   :  { %v210_v57 = vadd.f32 %v209_v55, %v208_v53  ;;  %v222_v58 = vrot.slane %v221_v56, 4  ;;  %v408_v53 = vlaneseq }
 0x13e   :  { %v211_v59 = vrot.slane %v210_v57, 2  ;;  %v223_v60 = vadd.f32 %v222_v58, %v221_v56  ;;  %v3268_v54 = vshrl.u32 %v408_v53, 7 }
 0x140   :  { %v212_v61 = vadd.f32 %v211_v59, %v210_v57  ;;  %v224_v62 = vrot.slane %v223_v60, 2  ;;  %v3271_v55 = vsub.s32 0, %v3268_v54  ;;  %v3274_v56 = vsub.s32 1, %v3268_v54 }
 0x141   :  { %vm489_vm4 = vcmp.lt.s32.totalorder %v3268_v54, 1  ;;  %vm506_vm5 = vcmp.lt.s32.totalorder %v3268_v54, 7 }
 0x142   :  { %v213_v63 = vrot.slane %v212_v61, 1  ;;  %v225_v1 = vadd.f32 %v224_v62, %v223_v60 }
 0x144   :  { %v226_v2 = vrot.slane %v225_v1, 1  ;;  %v214_v3 = vadd.f32 %v213_v63, %v212_v61 }
 0x146   :  { %v227_v4 = vadd.f32 %v226_v2, %v225_v1 }
 0x148   :  { %v229_v5 = vsel %vm228_vm2, %v214_v3, %v227_v4 }
 0x149   :  { %2350 = vmatmul.mubr.f32.vlgmr.msra.gmra.mrb[0].mxu1 %v229_v5  ;;  %v517_v5 = vld [vmem:[#allocation7 + $0x10] sm:$0xff] }
 0x14a   :  { %2649 = vmatpush3.bf16.msra.mxu1 %v3152_v14  ;;  %2503 = vmatprep.mubr.msk.f32.mxu1 %vm3004_vm1, %v3005_v40 }
 0x14b   :  { %2650 = vmatprep.subr.bf16.mxu1 %v3003_v0 }
 0x14e   :  { %2652 = vmatpush3.bf16.msra.mxu1 %v3158_v18 }
 0x14f   :  { %2653 = vmatprep.subr.bf16.mxu1 %v3003_v0 }
 0x152   :  { %2655 = vmatpush3.bf16.msra.mxu1 %v3172_v25  ;;  %v2555_v25 = vpack.c.bf16 %v534_v23, %v533_v22 }
 0x153   :  { %2656 = vmatprep.subr.bf16.mxu1 %v3003_v0 }
 0x156   :  { %2658 = vmatpush3.bf16.msra.mxu1 %v3182_v28  ;;  %v536_v28 = vld [vmem:[#allocation7 + $0xa8] sm:$0xff] }
 0x157   :  { %2659 = vmatprep.subr.bf16.mxu1 %v3003_v0  ;;  %v2559_v29 = vpack.c.bf16 %v536_v28, %v535_v27  ;;  %v521_v27 = vld [vmem:[#allocation7 + $0x30] sm:$0xff]  ;;  %v522_v28 = vld [vmem:[#allocation7 + $0x38] sm:$0xff] }
 0x15a   :  { %2661 = vmatpush3.bf16.msra.mxu1 %v2540_v31  ;;  %v538_v31 = vld [vmem:[#allocation7 + $0xb8] sm:$0xff] }
 0x15b   :  { %2662 = vmatprep.subr.bf16.mxu1 %v3003_v0  ;;  %v2563_v32 = vpack.c.bf16 %v538_v31, %v537_v30  ;;  %v2595_v31 = vpack.c.bf16 %v522_v28, %v521_v27 }
 0x15e   :  { %2664 = vmatpush3.bf16.msra.mxu1 %v2543_v34  ;;  %v540_v34 = vld [vmem:[#allocation7 + $0xc8] sm:$0xff] }
 0x15f   :  { %2665 = vmatprep.subr.bf16.mxu1 %v3003_v0  ;;  %v2567_v35 = vpack.c.bf16 %v540_v34, %v539_v33  ;;  %v524_v33 = vld [vmem:[#allocation7 + $0x48] sm:$0xff] }
 0x162   :  { %2667 = vmatpush3.bf16.msra.mxu1 %v2546_v37  ;;  %v542_v37 = vld [vmem:[#allocation7 + $0xd8] sm:$0xff] }
 0x163   :  { %2668 = vmatprep.subr.bf16.mxu1 %v3003_v0  ;;  %v2571_v38 = vpack.c.bf16 %v542_v37, %v541_v36  ;;  %v526_v36 = vld [vmem:[#allocation7 + $0x58] sm:$0xff] }
 0x166   :  { %2670 = vmatpush3.bf16.msra.mxu1 %v2549_v41  ;;  %v544_v41 = vld [vmem:[#allocation7 + $0xe8] sm:$0xff] }
 0x167   :  { %2506 = vmatprep.subr.mxu1 %v3005_v40  ;;  %v2575_v43 = vpack.c.bf16 %v544_v41, %v543_v39  ;;  %v528_v39 = vld [vmem:[#allocation7 + $0x68] sm:$0xff] }
 0x21c   :  { %v312_v10 = vpop.f32.mrb[0].mxu1 }
 0x21d   :  { %v316_v11 = vmul.f32 %v312_v10, %v312_v10  ;;  %v2351_v12 = vpop.f32.mrb[1].mxu1 }
 0x21f   :  { %v318_v13 = vrot.slane %v316_v11, 7 }
 0x221   :  { %v320_v14 = vsub.f32 %v312_v10, %v318_v13 }
 0x223   :  { %v321_v0 = vadd.f32 1e-05, %v320_v14  ;;  %v2587_v14 = vpack.c.bf16 %v518_v7, %v517_v5  ;;  %v727_v7 = vld [vmem:[#allocation7 + $0x150] sm:$0xff] }
 0x225   :  { %2867 = vrsqrt.f32 %v321_v0 }
 0x22f   :  { %v2868_v15 = vpop.eup %2867 }
 0x230   :  { %v324_v17 = vrot.slane %v2868_v15, 1 }
 0x232   :  { %v326_v18 = vmul.f32 %v324_v17, %v204_v16 }
 0x234   :  { %v327_v20 = vmul.f32 %v326_v18, %v312_v10 }
 0x236   :  { %v328_v21 = vsub.f32 %v205_v19, %v327_v20 }
 0x238   :  { %v330_v24 = vrot.slane %v328_v21, 7 }
 0x23a   :  { %v332_v26 = vsel %vm228_vm2, %v326_v18, %v330_v24 }
 0x23b   :  { %2355 = vmatmul.mubr.msk.f32.vlgmr.msra.gmra.mrb[4].mxu0 %vm334_vm3, %v332_v26 }
 0x23c   :  { %2554 = vmatpush3.bf16.msra.mxu0 %v2551_v9  ;;  %v437_v9 = vand.u32 15, %v3268_v54 }
 0x23d   :  { %2556 = vmatprep.subr.bf16.mxu0 %v2555_v25 }
 0x23e   :  { %vm2111_vm6 = vcmp.ne.s32.totalorder %v437_v9, 0 }
 0x240   :  { %2558 = vmatpush3.bf16.msra.mxu0 %v2555_v25 }
 0x241   :  { %2560 = vmatprep.subr.bf16.mxu0 %v2559_v29 }
 0x244   :  { %2562 = vmatpush3.bf16.msra.mxu0 %v2559_v29 }
 0x245   :  { %2564 = vmatprep.subr.bf16.mxu0 %v2563_v32 }
 0x248   :  { %2566 = vmatpush3.bf16.msra.mxu0 %v2563_v32  ;;  %v523_v32 = vld [vmem:[#allocation7 + $0x40] sm:$0xff] }
 0x249   :  { %2568 = vmatprep.subr.bf16.mxu0 %v2567_v35  ;;  %v2599_v34 = vpack.c.bf16 %v524_v33, %v523_v32 }
 0x24c   :  { %2570 = vmatpush3.bf16.msra.mxu0 %v2567_v35  ;;  %v525_v35 = vld [vmem:[#allocation7 + $0x50] sm:$0xff] }
 0x24d   :  { %2572 = vmatprep.subr.bf16.mxu0 %v2571_v38  ;;  %v2603_v37 = vpack.c.bf16 %v526_v36, %v525_v35 }
 0x250   :  { %2574 = vmatpush3.bf16.msra.mxu0 %v2571_v38  ;;  %v527_v38 = vld [vmem:[#allocation7 + $0x60] sm:$0xff] }
 0x251   :  { %2576 = vmatprep.subr.bf16.mxu0 %v2575_v43  ;;  %v2607_v41 = vpack.c.bf16 %v528_v39, %v527_v38 }
 0x254   :  { %2578 = vmatpush3.bf16.msra.mxu0 %v2575_v43  ;;  %v529_v43 = vld [vmem:[#allocation7 + $0x70] sm:$0xff] }
 0x255   :  { %2580 = vmatprep.subr.bf16.mxu0 %v2579_v47  ;;  %v2611_v46 = vpack.c.bf16 %v530_v45, %v529_v43  ;;  %v1028_v43 = vld [vmem:[%s4024_s3 + $0x8] sm:$0xff] }
 0x256   :  { %v1032_v45 = vld [vmem:[%s4024_s3 + $0x28] sm:$0xff] }
 0x258   :  { %2582 = vmatpush3.bf16.msra.mxu0 %v2579_v47  ;;  %v431_v47 = vadd.s32 16, %v3268_v54 }
 0x259   :  { %2584 = vmatprep.subr.bf16.mxu0 %v2583_v52 }
 0x25a   :  { %v451_v53 = vand.u32 15, %v431_v47 }
 0x25c   :  { %vm2112_vm7 = vcmp.ne.s32.totalorder %v451_v53, 0 }
 0x30e   :  { %v404_v57 = vpop.f32.mrb[4].mxu0 }
 0x30f   :  { %v411_v58 = vrot.slane %v404_v57, %v3271_v55  ;;  %v2356_v59 = vpop.f32.mrb[5].mxu0  ;;  %v419_v60 = vrot.slane %v404_v57, %v3274_v56  ;;  %v719_v57 = vld [vmem:[#allocation7 + $0x110] sm:$0xff] }
 0x311   :  { %v413_v61 = vmul.f32 %v3219_v42, %v411_v58  ;;  %v412_v62 = vmul.f32 %v411_v58, %v3223_v44  ;;  %v414_v63 = vmul.f32 %v411_v58, %v3231_v49  ;;  %v415_v1 = vmul.f32 %v3229_v48, %v411_v58  ;;  %v519_v42 = vld [vmem:[#allocation7 + $0x20] sm:$0xff]  ;;  %v520_v44 = vld [vmem:[#allocation7 + $0x28] sm:$0xff]  ;;  %v720_v58 = vld [vmem:[#allocation7 + $0x118] sm:$0xff] }
 0x312   :  { %v2591_v21 = vpack.c.bf16 %v520_v44, %v519_v42  ;;  %v2619_v59 = vpack.c.bf16 %v720_v58, %v719_v57  ;;  %v430_v42 = vadd.s32 8, %v3268_v54  ;;  %v822_v58 = vld [vmem:[%s4029_s8 + $0x2] sm:$0x1] }
 0x313   :  { %v420_v2 = vadd.f32 %v419_v60, %v412_v62  ;;  %v421_v3 = vadd.f32 %v419_v60, %v413_v61  ;;  %v422_v4 = vadd.f32 %v419_v60, %v414_v63  ;;  %v423_v8 = vadd.f32 %v419_v60, %v415_v1  ;;  %v721_v60 = vld [vmem:[#allocation7 + $0x120] sm:$0xff]  ;;  %v722_v61 = vld [vmem:[#allocation7 + $0x128] sm:$0xff]  ;;  %v723_v63 = vld [vmem:[#allocation7 + $0x130] sm:$0xff] }
 0x314   :  { %v2623_v62 = vpack.c.bf16 %v722_v61, %v721_v60  ;;  %v724_v1 = vld [vmem:[#allocation7 + $0x138] sm:$0xff]  ;;  %v823_v61 = vld [vmem:[%s4029_s8 + $0x3] sm:$0x1] }
 0x315   :  { %v424_v10 = vmax.f32 %v420_v2, 0.0  ;;  %v425_v11 = vmax.f32 %v421_v3, 0.0  ;;  %v426_v12 = vmax.f32 %v422_v4, 0.0  ;;  %v427_v13 = vmax.f32 %v423_v8, 0.0  ;;  %v725_v3 = vld [vmem:[#allocation7 + $0x140] sm:$0xff]  ;;  %v726_v4 = vld [vmem:[#allocation7 + $0x148] sm:$0xff] }
 0x316   :  { %v2627_v2 = vpack.c.bf16 %v724_v1, %v723_v63  ;;  %v2631_v5 = vpack.c.bf16 %v726_v4, %v725_v3  ;;  %v728_v8 = vld [vmem:[#allocation7 + $0x158] sm:$0xff]  ;;  %v1027_v63 = vld [vmem:[%s4024_s3] sm:$0xff]  ;;  %v1036_v3 = vld [vmem:[%s4024_s3 + $0x48] sm:$0xff] }
 0x317   :  { %2389 = vmatprep.mubr.f32.mxu0 %v424_v10  ;;  %v504_v48 = vrot.slane %v426_v12, 1  ;;  %v485_v49 = vrot.slane %v424_v10, 7  ;;  %v488_v0 = vrot.slane %v427_v13, 7  ;;  %v486_v15 = vrot.slane %v425_v11, 7  ;;  %v1031_v1 = vld [vmem:[%s4024_s3 + $0x20] sm:$0xff]  ;;  %v1040_v4 = vld [vmem:[%s4024_s3 + $0x68] sm:$0xff] }
 0x318   :  { %2390 = vmatmul.mubr.f32.vlgmr.msra.gmra.mrb[6].mxu0 %v425_v11  ;;  %v487_v16 = vrot.slane %v426_v12, 7  ;;  %v502_v17 = vrot.slane %v424_v10, 1  ;;  %v503_v18 = vrot.slane %v425_v11, 1  ;;  %v505_v19 = vrot.slane %v427_v13, 1  ;;  %v729_v10 = vld [vmem:[#allocation7 + $0x160] sm:$0xff]  ;;  %v730_v11 = vld [vmem:[#allocation7 + $0x168] sm:$0xff] }
 0x319   :  { %2586 = vmatpush3.bf16.msra.mxu0 %v2583_v52  ;;  %2392 = vmatprep.mubr.f32.mxu0 %v426_v12  ;;  %v493_v20 = vsel %vm489_vm4, %v488_v0, %v485_v49  ;;  %v492_v22 = vsel %vm489_vm4, %v485_v49, %v486_v15  ;;  %v2615_v52 = vpack.c.bf16 %v718_v51, %v717_v50  ;;  %v432_v49 = vadd.s32 24, %v3268_v54 }
 0x31a   :  { %2588 = vmatprep.subr.bf16.mxu0 %v2587_v14  ;;  %v491_v23 = vsel %vm489_vm4, %v486_v15, %v487_v16  ;;  %v490_v24 = vsel %vm489_vm4, %v487_v16, %v488_v0  ;;  %v509_v25 = vsel %vm506_vm5, %v502_v17, %v503_v18  ;;  %v3297_v26 = vsel %vm506_vm5, %v503_v18, %v504_v48 }
 0x31b   :  { %v3301_v29 = vsel %vm506_vm5, %v504_v48, %v505_v19  ;;  %v3305_v30 = vsel %vm506_vm5, %v505_v19, %v502_v17  ;;  %v2635_v9 = vpack.c.bf16 %v728_v8, %v727_v7  ;;  %v2639_v12 = vpack.c.bf16 %v730_v11, %v729_v10  ;;  %v1039_v10 = vld [vmem:[%s4024_s3 + $0x60] sm:$0xff] }
 0x31c   :  { %2393 = vmatmul.mubr.f32.gmra.mrb[8].mxu0 %v427_v13  ;;  %v731_v13 = vld [vmem:[#allocation7 + $0x170] sm:$0xff]  ;;  %v444_v48 = vand.u32 15, %v430_v42  ;;  %v458_v0 = vand.u32 15, %v432_v49  ;;  %v2673_v7 = vpack.c.bf16 %v1031_v1, %v1027_v63  ;;  %v2675_v8 = vpack.c.bf16 %v1040_v4, %v1036_v3  ;;  %v1052_v49 = vld [vmem:[%s4024_s3 + $0xc8] sm:$0xff]  ;;  %v1038_v4 = vld [vmem:[%s4024_s3 + $0x58] sm:$0xff] }
 0x31d   :  { %2590 = vmatpush3.bf16.msra.mxu0 %v2587_v14  ;;  %2427 = vmatprep.mubr.msk.f32.mxu0 %vm2111_vm6, %v493_v20  ;;  %v732_v14 = vld [vmem:[#allocation7 + $0x178] sm:$0xff]  ;;  %v1033_v63 = vld [vmem:[%s4024_s3 + $0x30] sm:$0xff] }
 0x31e   :  { %2592 = vmatprep.subr.bf16.mxu0 %v2591_v21  ;;  %v2643_v44 = vpack.c.bf16 %v732_v14, %v731_v13  ;;  %vm2113_vm8 = vcmp.ne.s32.totalorder %v444_v48, 15  ;;  %vm2114_vm9 = vcmp.ne.s32.totalorder %v458_v0, 15  ;;  %v1048_v13 = vld [vmem:[%s4024_s3 + $0xa8] sm:$0xff]  ;;  %v1047_v48 = vld [vmem:[%s4024_s3 + $0xa0] sm:$0xff] }
 0x31f   :  { %v1056_v0 = vld [vmem:[%s4024_s3 + $0xe8] sm:$0xff] }
 0x321   :  { %2594 = vmatpush3.bf16.msra.mxu0 %v2591_v21 }
 0x322   :  { %2596 = vmatprep.subr.bf16.mxu0 %v2595_v31 }
 0x325   :  { %2598 = vmatpush3.bf16.msra.mxu0 %v2595_v31 }
 0x326   :  { %2600 = vmatprep.subr.bf16.mxu0 %v2599_v34 }
 0x329   :  { %2602 = vmatpush3.bf16.msra.mxu0 %v2599_v34 }
 0x32a   :  { %2604 = vmatprep.subr.bf16.mxu0 %v2603_v37 }
 0x32d   :  { %2606 = vmatpush3.bf16.msra.mxu0 %v2603_v37 }
 0x32e   :  { %2608 = vmatprep.subr.bf16.mxu0 %v2607_v41 }
 0x331   :  { %2610 = vmatpush3.bf16.msra.mxu0 %v2607_v41 }
 0x332   :  { %2612 = vmatprep.subr.bf16.mxu0 %v2611_v46 }
 0x335   :  { %2614 = vmatpush3.bf16.msra.mxu0 %v2611_v46  ;;  %v2671_v46 = vpack.c.bf16 %v1032_v45, %v1028_v43  ;;  %v1084_v43 = vld [vmem:[%s4024_s3 + $0x1c8] sm:$0xff] }
 0x336   :  { %2616 = vmatprep.subr.bf16.mxu0 %v2615_v52  ;;  %v1088_v45 = vld [vmem:[%s4024_s3 + $0x1e8] sm:$0xff] }
 0x338   :  { %2428 = vmatmul.mubr.f32.vlgmr.msra.gmra.mrb[6].mxu0 %v492_v22 }
 0x339   :  { %2430 = vmatprep.mubr.msk.f32.mxu0 %vm2112_vm7, %v491_v23  ;;  %2618 = vmatpush3.bf16.msra.mxu0 %v2615_v52 }
 0x33a   :  { %2620 = vmatprep.subr.bf16.mxu0 %v2619_v59 }
 0x33c   :  { %2431 = vmatmul.mubr.f32.gmra.mrb[8].mxu0 %v490_v24 }
 0x33d   :  { %2622 = vmatpush3.bf16.msra.mxu0 %v2619_v59  ;;  %2465 = vmatprep.mubr.f32.mxu0 %v509_v25 }
 0x33e   :  { %2624 = vmatprep.subr.bf16.mxu0 %v2623_v62 }
 0x341   :  { %2626 = vmatpush3.bf16.msra.mxu0 %v2623_v62 }
 0x342   :  { %2628 = vmatprep.subr.bf16.mxu0 %v2627_v2 }
 0x345   :  { %2630 = vmatpush3.bf16.msra.mxu0 %v2627_v2 }
 0x346   :  { %2632 = vmatprep.subr.bf16.mxu0 %v2631_v5 }
 0x349   :  { %2634 = vmatpush3.bf16.msra.mxu0 %v2631_v5 }
 0x34a   :  { %2636 = vmatprep.subr.bf16.mxu0 %v2635_v9 }
 0x34d   :  { %2638 = vmatpush3.bf16.msra.mxu0 %v2635_v9  ;;  %v1035_v9 = vld [vmem:[%s4024_s3 + $0x40] sm:$0xff] }
 0x34e   :  { %2640 = vmatprep.subr.bf16.mxu0 %v2639_v12  ;;  %v2677_v14 = vpack.c.bf16 %v1039_v10, %v1035_v9  ;;  %v1037_v10 = vld [vmem:[%s4024_s3 + $0x50] sm:$0xff] }
 0x351   :  { %2642 = vmatpush3.bf16.msra.mxu0 %v2639_v12  ;;  %v1044_v12 = vld [vmem:[%s4024_s3 + $0x88] sm:$0xff] }
 0x352   :  { %2644 = vmatprep.subr.bf16.mxu0 %v2643_v44  ;;  %v2679_v42 = vpack.c.bf16 %v1048_v13, %v1044_v12  ;;  %v1046_v12 = vld [vmem:[%s4024_s3 + $0x98] sm:$0xff] }
 0x353   :  { %v1050_v13 = vld [vmem:[%s4024_s3 + $0xb8] sm:$0xff] }
 0x355   :  { %2646 = vmatpush3.bf16.msra.mxu0 %v2643_v44  ;;  %v1043_v44 = vld [vmem:[%s4024_s3 + $0x80] sm:$0xff] }
 0x358   :  { %2466 = vmatmul.mubr.msk.f32.vlgmr.msra.gmra.mrb[6].mxu0 %vm2113_vm8, %v3297_v26 }
 0x359   :  { %2468 = vmatprep.mubr.f32.mxu0 %v3301_v29 }
 0x35c   :  { %2469 = vmatmul.mubr.msk.f32.gmra.mrb[8].mxu0 %vm2114_vm9, %v3305_v30 }
 0x42b   :  { %v3313_v15 = vpop.f32.mrb[6].mxu0 }
 0x42c   :  { %v834_v16 = vmul.f32 %v3313_v15, %v3313_v15  ;;  %v3317_v17 = vpop.f32.mrb[7].mxu0 }
 0x42d   :  { %v824_v54 = vadd.f32 %v3313_v15, %v3317_v17  ;;  %v833_v18 = vmul.f32 %v3317_v17, %v3317_v17 }
 0x42f   :  { %v837_v19 = vadd.f32 %v834_v16, %v833_v18  ;;  %v3323_v20 = vpop.f32.mrb[8].mxu0  ;;  %v2681_v16 = vpack.c.bf16 %v1047_v48, %v1043_v44  ;;  %v1051_v18 = vld [vmem:[%s4024_s3 + $0xc0] sm:$0xff]  ;;  %v2711_v44 = vpack.c.bf16 %v1050_v13, %v1046_v12  ;;  %v1045_v48 = vld [vmem:[%s4024_s3 + $0x90] sm:$0xff]  ;;  %v1370_v13 = vld [vmem:[%s4027_s6 + $0x38] sm:$0xff] }
 0x430   :  { %v3325_v21 = vpop.f32.mrb[9].mxu0  ;;  %v836_v24 = vmul.f32 %v3323_v20, %v3323_v20  ;;  %v1369_v12 = vld [vmem:[%s4027_s6 + $0x30] sm:$0xff] }
 0x431   :  { %v825_v22 = vadd.f32 %v824_v54, %v3325_v21  ;;  %v835_v23 = vmul.f32 %v3325_v21, %v3325_v21  ;;  %v2683_v54 = vpack.c.bf16 %v1056_v0, %v1052_v49  ;;  %v1049_v49 = vld [vmem:[%s4024_s3 + $0xb0] sm:$0xff]  ;;  %v1054_v0 = vld [vmem:[%s4024_s3 + $0xd8] sm:$0xff] }
 0x433   :  { %v826_v25 = vadd.f32 %v3323_v20, %v825_v22  ;;  %v838_v26 = vadd.f32 %v837_v19, %v835_v23  ;;  %v1055_v19 = vld [vmem:[%s4024_s3 + $0xe0] sm:$0xff]  ;;  %v1060_v22 = vld [vmem:[%s4024_s3 + $0x108] sm:$0xff] }
 0x434   :  { %v1064_v23 = vld [vmem:[%s4024_s3 + $0x128] sm:$0xff] }
 0x435   :  { %v827_v27 = vrot.slane %v826_v25, 4  ;;  %v839_v28 = vadd.f32 %v838_v26, %v836_v24  ;;  %v2685_v24 = vpack.c.bf16 %v1055_v19, %v1051_v18  ;;  %v1059_v26 = vld [vmem:[%s4024_s3 + $0x100] sm:$0xff] }
 0x437   :  { %v828_v29 = vadd.f32 %v827_v27, %v826_v25  ;;  %v840_v30 = vrot.slane %v839_v28, 4  ;;  %v2687_v25 = vpack.c.bf16 %v1064_v23, %v1060_v22  ;;  %v1063_v27 = vld [vmem:[%s4024_s3 + $0x120] sm:$0xff]  ;;  %v1053_v22 = vld [vmem:[%s4024_s3 + $0xd0] sm:$0xff] }
 0x438   :  { %v1057_v23 = vld [vmem:[%s4024_s3 + $0xf0] sm:$0xff] }
 0x439   :  { %v829_v31 = vrot.slane %v828_v29, 2  ;;  %v841_v32 = vadd.f32 %v840_v30, %v839_v28  ;;  %v1068_v28 = vld [vmem:[%s4024_s3 + $0x148] sm:$0xff]  ;;  %v2689_v30 = vpack.c.bf16 %v1063_v27, %v1059_v26  ;;  %v2717_v26 = vpack.c.bf16 %v1057_v23, %v1053_v22  ;;  %v1373_v22 = vld [vmem:[%s4027_s6 + $0x50] sm:$0xff]  ;;  %v1374_v23 = vld [vmem:[%s4027_s6 + $0x58] sm:$0xff] }
 0x43b   :  { %v830_v33 = vadd.f32 %v829_v31, %v828_v29  ;;  %v842_v34 = vrot.slane %v841_v32, 2  ;;  %v1072_v29 = vld [vmem:[%s4024_s3 + $0x168] sm:$0xff] }
 0x43c   :  { %v2691_v31 = vpack.c.bf16 %v1072_v29, %v1068_v28  ;;  %v1061_v29 = vld [vmem:[%s4024_s3 + $0x110] sm:$0xff] }
 0x43d   :  { %v831_v35 = vrot.slane %v830_v33, 1  ;;  %v843_v36 = vadd.f32 %v842_v34, %v841_v32  ;;  %v1067_v32 = vld [vmem:[%s4024_s3 + $0x140] sm:$0xff] }
 0x43f   :  { %v844_v37 = vrot.slane %v843_v36, 1  ;;  %v832_v38 = vadd.f32 %v831_v35, %v830_v33  ;;  %v1071_v33 = vld [vmem:[%s4024_s3 + $0x160] sm:$0xff]  ;;  %v1076_v35 = vld [vmem:[%s4024_s3 + $0x188] sm:$0xff] }
 0x440   :  { %v2693_v34 = vpack.c.bf16 %v1071_v33, %v1067_v32  ;;  %v1074_v32 = vld [vmem:[%s4024_s3 + $0x178] sm:$0xff] }
 0x441   :  { %v845_v39 = vadd.f32 %v844_v37, %v843_v36  ;;  %v1080_v36 = vld [vmem:[%s4024_s3 + $0x1a8] sm:$0xff] }
 0x442   :  { %v2695_v37 = vpack.c.bf16 %v1080_v36, %v1076_v35  ;;  %v1069_v35 = vld [vmem:[%s4024_s3 + $0x150] sm:$0xff] }
 0x443   :  { %v846_v41 = vsel %vm228_vm2, %v832_v38, %v845_v39  ;;  %v1075_v38 = vld [vmem:[%s4024_s3 + $0x180] sm:$0xff]  ;;  %v1073_v36 = vld [vmem:[%s4024_s3 + $0x170] sm:$0xff] }
 0x444   :  { %2504 = vmatmul.mubr.f32.vlgmr.msra.gmra.mrb[2].mxu1 %v846_v41  ;;  %v1079_v39 = vld [vmem:[%s4024_s3 + $0x1a0] sm:$0xff] }
 0x445   :  { %2507 = vmatpush3.msra.mxu1 %v3257_v6  ;;  %2508 = vmatprep.mubr.msk.f32.mxu1 %vm3004_vm1, %v3005_v40  ;;  %v2697_v41 = vpack.c.bf16 %v1079_v39, %v1075_v38  ;;  %v1082_v38 = vld [vmem:[%s4024_s3 + $0x1b8] sm:$0xff]  ;;  %v2725_v39 = vpack.c.bf16 %v1073_v36, %v1069_v35 }
 0x446   :  { %2672 = vmatprep.subr.bf16.mxu1 %v2671_v46  ;;  %v2699_v46 = vpack.c.bf16 %v1088_v45, %v1084_v43  ;;  %v1077_v43 = vld [vmem:[%s4024_s3 + $0x190] sm:$0xff]  ;;  %v1378_v35 = vld [vmem:[%s4027_s6 + $0x78] sm:$0xff] }
 0x447   :  { %v1081_v45 = vld [vmem:[%s4024_s3 + $0x1b0] sm:$0xff] }
 0x517   :  { %v913_v47 = vpop.f32.mrb[2].mxu1 }
 0x518   :  { %v917_v50 = vmul.f32 %v913_v47, %v913_v47  ;;  %v2505_v51 = vpop.f32.mrb[3].mxu1 }
 0x519   :  { %v1030_v51 = vld [vmem:[%s4024_s3 + $0x18] sm:$0xff] }
 0x51a   :  { %v919_v52 = vrot.slane %v917_v50, 7  ;;  %v1087_v50 = vld [vmem:[%s4024_s3 + $0x1e0] sm:$0xff] }
 0x51c   :  { %v921_v53 = vsub.f32 %v913_v47, %v919_v52 }
 0x51e   :  { %v922_v57 = vadd.f32 1e-05, %v921_v53  ;;  %v1034_v53 = vld [vmem:[%s4024_s3 + $0x38] sm:$0xff] }
 0x520   :  { %2869 = vrsqrt.f32 %v922_v57  ;;  %v2703_v57 = vpack.c.bf16 %v1034_v53, %v1030_v51  ;;  %v1089_v53 = vld [vmem:[%s4024_s3 + $0x1f0] sm:$0xff] }
 0x52a   :  { %v2870_v6 = vpop.eup %2869 }
 0x52b   :  { %v925_v59 = vrot.slane %v2870_v6, 1 }
 0x52d   :  { %v927_v60 = vmul.f32 %v925_v59, %v822_v58 }
 0x52f   :  { %v928_v62 = vmul.f32 %v927_v60, %v913_v47  ;;  %v1083_v47 = vld [vmem:[%s4024_s3 + $0x1c0] sm:$0xff] }
 0x530   :  { %v2701_v52 = vpack.c.bf16 %v1087_v50, %v1083_v47  ;;  %v1090_v47 = vld [vmem:[%s4024_s3 + $0x1f8] sm:$0xff]  ;;  %v2729_v50 = vpack.c.bf16 %v1081_v45, %v1077_v43  ;;  %v1396_v43 = vld [vmem:[%s4027_s6 + $0x108] sm:$0xff] }
 0x531   :  { %v929_v2 = vsub.f32 %v823_v61, %v928_v62  ;;  %v1029_v62 = vld [vmem:[%s4024_s3 + $0x10] sm:$0xff] }
 0x533   :  { %v931_v5 = vrot.slane %v929_v2, 7 }
 0x535   :  { %v933_v11 = vsel %vm228_vm2, %v927_v60, %v931_v5 }
 0x536   :  { %2509 = vmatmul.mubr.msk.f32.vlgmr.msra.gmra.mrb[4].mxu1 %vm334_vm3, %v933_v11  ;;  %v1041_v11 = vld [vmem:[%s4024_s3 + $0x70] sm:$0xff] }
 0x537   :  { %2674 = vmatpush1.bf16.msra.mxu1 %v2673_v7  ;;  %1155 = vmatprep.mubr.f32.mxu1 %v3005_v40 }
 0x538   :  { %2676 = vmatprep.subr.bf16.mxu1 %v2675_v8 }
 0x53b   :  { %2678 = vmatpush1.bf16.msra.mxu1 %v2677_v14  ;;  %v2709_v14 = vpack.c.bf16 %v1041_v11, %v1037_v10  ;;  %v1386_v10 = vld [vmem:[%s4027_s6 + $0xb8] sm:$0xff] }
 0x53c   :  { %2680 = vmatprep.subr.bf16.mxu1 %v2679_v42 }
 0x53f   :  { %2682 = vmatpush1.bf16.msra.mxu1 %v2681_v16  ;;  %v1058_v16 = vld [vmem:[%s4024_s3 + $0xf8] sm:$0xff] }
 0x540   :  { %2684 = vmatprep.subr.bf16.mxu1 %v2683_v54  ;;  %v2713_v54 = vpack.c.bf16 %v1049_v49, %v1045_v48  ;;  %v2715_v19 = vpack.c.bf16 %v1058_v16, %v1054_v0  ;;  %v1371_v49 = vld [vmem:[%s4027_s6 + $0x40] sm:$0xff]  ;;  %v1372_v0 = vld [vmem:[%s4027_s6 + $0x48] sm:$0xff] }
 0x541   :  { %v2753_v16 = vpack.c.bf16 %v1372_v0, %v1371_v49  ;;  %v1408_v49 = vld [vmem:[%s4027_s6 + $0x168] sm:$0xff] }
 0x543   :  { %2686 = vmatpush1.bf16.msra.mxu1 %v2685_v24  ;;  %v1062_v24 = vld [vmem:[%s4024_s3 + $0x118] sm:$0xff] }
 0x544   :  { %2688 = vmatprep.subr.bf16.mxu1 %v2687_v25  ;;  %v1066_v25 = vld [vmem:[%s4024_s3 + $0x138] sm:$0xff] }
 0x545   :  { %v2719_v28 = vpack.c.bf16 %v1066_v25, %v1062_v24  ;;  %v2757_v24 = vpack.c.bf16 %v1374_v23, %v1373_v22  ;;  %v1391_v25 = vld [vmem:[%s4027_s6 + $0xe0] sm:$0xff]  ;;  %v1410_v22 = vld [vmem:[%s4027_s6 + $0x178] sm:$0xff] }
 0x547   :  { %2690 = vmatpush1.bf16.msra.mxu1 %v2689_v30  ;;  %v1065_v30 = vld [vmem:[%s4024_s3 + $0x130] sm:$0xff] }
 0x548   :  { %2692 = vmatprep.subr.bf16.mxu1 %v2691_v31  ;;  %v1070_v31 = vld [vmem:[%s4024_s3 + $0x158] sm:$0xff]  ;;  %v2721_v33 = vpack.c.bf16 %v1065_v30, %v1061_v29  ;;  %v1376_v29 = vld [vmem:[%s4027_s6 + $0x68] sm:$0xff] }
 0x54b   :  { %2694 = vmatpush1.bf16.msra.mxu1 %v2693_v34  ;;  %v2723_v34 = vpack.c.bf16 %v1074_v32, %v1070_v31  ;;  %v1393_v31 = vld [vmem:[%s4027_s6 + $0xf0] sm:$0xff]  ;;  %v1394_v32 = vld [vmem:[%s4027_s6 + $0xf8] sm:$0xff] }
 0x54c   :  { %2696 = vmatprep.subr.bf16.mxu1 %v2695_v37  ;;  %v1078_v37 = vld [vmem:[%s4024_s3 + $0x198] sm:$0xff] }
 0x54f   :  { %2698 = vmatpush1.bf16.msra.mxu1 %v2697_v41  ;;  %v2727_v41 = vpack.c.bf16 %v1082_v38, %v1078_v37  ;;  %v1411_v37 = vld [vmem:[%s4027_s6 + $0x180] sm:$0xff]  ;;  %v1412_v38 = vld [vmem:[%s4027_s6 + $0x188] sm:$0xff] }
 0x550   :  { %2700 = vmatprep.subr.bf16.mxu1 %v2699_v46  ;;  %v1086_v46 = vld [vmem:[%s4024_s3 + $0x1d8] sm:$0xff] }
 0x551   :  { %v2731_v51 = vpack.c.bf16 %v1090_v47, %v1086_v46  ;;  %v1413_v46 = vld [vmem:[%s4027_s6 + $0x190] sm:$0xff]  ;;  %v1414_v47 = vld [vmem:[%s4027_s6 + $0x198] sm:$0xff] }
 0x553   :  { %2702 = vmatpush1.bf16.msra.mxu1 %v2701_v52  ;;  %v1085_v52 = vld [vmem:[%s4024_s3 + $0x1d0] sm:$0xff] }
 0x554   :  { %2704 = vmatprep.subr.bf16.mxu1 %v2703_v57  ;;  %v2733_v57 = vpack.c.bf16 %v1089_v53, %v1085_v52  ;;  %v1398_v52 = vld [vmem:[%s4027_s6 + $0x118] sm:$0xff] }
 0x609   :  { %v1003_v6 = vpop.f32.mrb[4].mxu1 }
 0x60a   :  { %v1010_v58 = vrot.slane %v1003_v6, %v3271_v55  ;;  %v2510_v59 = vpop.f32.mrb[5].mxu1  ;;  %v1018_v60 = vrot.slane %v1003_v6, %v3274_v56  ;;  %v1379_v6 = vld [vmem:[%s4027_s6 + $0x80] sm:$0xff] }
 0x60c   :  { %v1011_v61 = vmul.f32 %v1010_v58, %v3317_v17  ;;  %v1012_v1 = vmul.f32 %v3313_v15, %v1010_v58  ;;  %v1013_v2 = vmul.f32 %v1010_v58, %v3325_v21  ;;  %v1014_v3 = vmul.f32 %v3323_v20, %v1010_v58  ;;  %v1042_v17 = vld [vmem:[%s4024_s3 + $0x78] sm:$0xff]  ;;  %v1380_v58 = vld [vmem:[%s4027_s6 + $0x88] sm:$0xff] }
 0x60d   :  { %v2705_v15 = vpack.c.bf16 %v1033_v63, %v1029_v62  ;;  %v2707_v20 = vpack.c.bf16 %v1042_v17, %v1038_v4  ;;  %v2735_v59 = vpack.c.bf16 %v1380_v58, %v1379_v6  ;;  %v1381_v63 = vld [vmem:[%s4027_s6 + $0x90] sm:$0xff]  ;;  %v1366_v4 = vld [vmem:[%s4027_s6 + $0x18] sm:$0xff]  ;;  %v1416_v6 = vld [vmem:[%s4027_s6 + $0x1a8] sm:$0xff] }
 0x60e   :  { %v3466_v5 = vadd.f32 %v1018_v60, %v1011_v61  ;;  %v3468_v7 = vadd.f32 %v1018_v60, %v1012_v1  ;;  %v3470_v8 = vadd.f32 %v1018_v60, %v1013_v2  ;;  %v3472_v9 = vadd.f32 %v1018_v60, %v1014_v3  ;;  %v1363_v60 = vld [vmem:[%s4027_s6] sm:$0xff]  ;;  %v1364_v61 = vld [vmem:[%s4027_s6 + $0x8] sm:$0xff]  ;;  %v1382_v1 = vld [vmem:[%s4027_s6 + $0x98] sm:$0xff] }
 0x60f   :  { %v2737_v62 = vpack.c.bf16 %v1364_v61, %v1363_v60  ;;  %2736 = vmatprep.subr.bf16.mxu0 %v2735_v59  ;;  %v2739_v2 = vpack.c.bf16 %v1382_v1, %v1381_v63  ;;  %v1365_v3 = vld [vmem:[%s4027_s6 + $0x10] sm:$0xff]  ;;  %v1399_v59 = vld [vmem:[%s4027_s6 + $0x120] sm:$0xff]  ;;  %v1400_v60 = vld [vmem:[%s4027_s6 + $0x128] sm:$0xff] }
 0x610   :  { %v1023_v21 = vmax.f32 %v3466_v5, 0.0  ;;  %v1024_v42 = vmax.f32 %v3468_v7, 0.0  ;;  %v1025_v18 = vmax.f32 %v3470_v8, 0.0  ;;  %v1026_v27 = vmax.f32 %v3472_v9, 0.0  ;;  %v1383_v5 = vld [vmem:[%s4027_s6 + $0xa0] sm:$0xff]  ;;  %v1384_v7 = vld [vmem:[%s4027_s6 + $0xa8] sm:$0xff] }
 0x611   :  { %2738 = vmatpush3.bf16.msra.mxu0 %v2737_v62  ;;  %v2741_v17 = vpack.c.bf16 %v1366_v4, %v1365_v3  ;;  %v2743_v8 = vpack.c.bf16 %v1384_v7, %v1383_v5  ;;  %v1367_v9 = vld [vmem:[%s4027_s6 + $0x20] sm:$0xff]  ;;  %v2777_v61 = vpack.c.bf16 %v1400_v60, %v1399_v59  ;;  %v1417_v62 = vld [vmem:[%s4027_s6 + $0x1b0] sm:$0xff]  ;;  %v1418_v63 = vld [vmem:[%s4027_s6 + $0x1b8] sm:$0xff] }
 0x612   :  { %1156 = vmatmul.mubr.f32.vlgmr.msra.gmra.mrb[6].mxu1 %v1023_v21  ;;  %2740 = vmatprep.subr.bf16.mxu0 %v2739_v2  ;;  %v2779_v1 = vpack.c.bf16 %v1418_v63, %v1417_v62  ;;  %v1401_v2 = vld [vmem:[%s4027_s6 + $0x130] sm:$0xff]  ;;  %v1402_v3 = vld [vmem:[%s4027_s6 + $0x138] sm:$0xff]  ;;  %v1420_v5 = vld [vmem:[%s4027_s6 + $0x1c8] sm:$0xff] }
 0x613   :  { %2706 = vmatpush1.bf16.msra.mxu1 %v2705_v15  ;;  %1161 = vmatprep.mubr.f32.mxu1 %v3005_v40  ;;  %v1368_v15 = vld [vmem:[%s4027_s6 + $0x28] sm:$0xff]  ;;  %v2781_v4 = vpack.c.bf16 %v1402_v3, %v1401_v2 }
 0x614   :  { %2708 = vmatprep.subr.bf16.mxu1 %v2707_v20  ;;  %v1385_v20 = vld [vmem:[%s4027_s6 + $0xb0] sm:$0xff] }
 0x615   :  { %2742 = vmatpush3.bf16.msra.mxu0 %v2741_v17  ;;  %v2747_v11 = vpack.c.bf16 %v1386_v10, %v1385_v20  ;;  %v1419_v17 = vld [vmem:[%s4027_s6 + $0x1c0] sm:$0xff]  ;;  %v1422_v20 = vld [vmem:[%s4027_s6 + $0x1d8] sm:$0xff] }
 0x616   :  { %1162 = vmatmul.mubr.f32.gmra.mrb[8].mxu1 %v1024_v42  ;;  %2744 = vmatprep.subr.bf16.mxu0 %v2743_v8  ;;  %v2783_v7 = vpack.c.bf16 %v1420_v5, %v1419_v17  ;;  %v1403_v8 = vld [vmem:[%s4027_s6 + $0x140] sm:$0xff] }
 0x617   :  { %2710 = vmatpush1.bf16.msra.mxu1 %v2709_v14  ;;  %1167 = vmatprep.mubr.f32.mxu1 %v3005_v40  ;;  %v2749_v14 = vpack.c.bf16 %v1370_v13, %v1369_v12  ;;  %v1406_v12 = vld [vmem:[%s4027_s6 + $0x158] sm:$0xff] }
 0x618   :  { %2712 = vmatprep.subr.bf16.mxu1 %v2711_v44  ;;  %v1388_v44 = vld [vmem:[%s4027_s6 + $0xc8] sm:$0xff] }
 0x61a   :  { %1168 = vmatmul.mubr.f32.gmra.mrb[10].mxu1 %v1025_v18 }
 0x61b   :  { %2714 = vmatpush1.bf16.msra.mxu1 %v2713_v54  ;;  %1173 = vmatprep.mubr.f32.mxu1 %v3005_v40  ;;  %v1389_v54 = vld [vmem:[%s4027_s6 + $0xd0] sm:$0xff] }
 0x61c   :  { %2716 = vmatprep.subr.bf16.mxu1 %v2715_v19 }
 0x61e   :  { %1174 = vmatmul.mubr.f32.gmra.mrb[12].mxu1 %v1026_v27 }
 0x61f   :  { %2718 = vmatpush1.bf16.msra.mxu1 %v2717_v26  ;;  %1244 = vmatprep.mubr.f32.mxu1 %v3005_v40  ;;  %v1392_v26 = vld [vmem:[%s4027_s6 + $0xe8] sm:$0xff] }
 0x620   :  { %2720 = vmatprep.subr.bf16.mxu1 %v2719_v28  ;;  %v1375_v28 = vld [vmem:[%s4027_s6 + $0x60] sm:$0xff] }
 0x621   :  { %v2761_v30 = vpack.c.bf16 %v1376_v29, %v1375_v28 }
 0x623   :  { %2722 = vmatpush1.bf16.msra.mxu1 %v2721_v33  ;;  %v1377_v33 = vld [vmem:[%s4027_s6 + $0x70] sm:$0xff] }
 0x624   :  { %2724 = vmatprep.subr.bf16.mxu1 %v2723_v34  ;;  %v2763_v34 = vpack.c.bf16 %v1394_v32, %v1393_v31  ;;  %v2765_v36 = vpack.c.bf16 %v1378_v35, %v1377_v33 }
 0x627   :  { %2726 = vmatpush1.bf16.msra.mxu1 %v2725_v39  ;;  %v2767_v39 = vpack.c.bf16 %v1412_v38, %v1411_v37 }
 0x628   :  { %2728 = vmatprep.subr.bf16.mxu1 %v2727_v41  ;;  %v1395_v41 = vld [vmem:[%s4027_s6 + $0x100] sm:$0xff] }
 0x629   :  { %v2769_v45 = vpack.c.bf16 %v1396_v43, %v1395_v41 }
 0x62b   :  { %2730 = vmatpush1.bf16.msra.mxu1 %v2729_v50  ;;  %v2771_v50 = vpack.c.bf16 %v1414_v47, %v1413_v46 }
 0x62c   :  { %2732 = vmatprep.subr.bf16.mxu1 %v2731_v51  ;;  %v1397_v51 = vld [vmem:[%s4027_s6 + $0x110] sm:$0xff] }
 0x62d   :  { %v2773_v53 = vpack.c.bf16 %v1398_v52, %v1397_v51 }
 0x62f   :  { %2734 = vmatpush1.bf16.msra.mxu1 %v2733_v57  ;;  %v1415_v57 = vld [vmem:[%s4027_s6 + $0x1a0] sm:$0xff] }
 0x630   :  { %2768 = vmatprep.subr.bf16.mxu1 %v2767_v39  ;;  %v2775_v58 = vpack.c.bf16 %v1416_v6, %v1415_v57 }
 0x632   :  { %1245 = vmatmul.mubr.f32.vlgmr.msra.gmra.mrb[14].mxu1 %v1023_v21  ;;  %v2745_v21 = vpack.c.bf16 %v1368_v15, %v1367_v9  ;;  %v1404_v9 = vld [vmem:[%s4027_s6 + $0x148] sm:$0xff] }
 0x633   :  { %1250 = vmatprep.mubr.f32.mxu1 %v3005_v40  ;;  %2770 = vmatpush3.bf16.msra.mxu1 %v2769_v45  ;;  %v2785_v15 = vpack.c.bf16 %v1404_v9, %v1403_v8 }
 0x634   :  { %2746 = vmatpush3.bf16.msra.mxu0 %v2745_v21  ;;  %2772 = vmatprep.subr.bf16.mxu1 %v2771_v50  ;;  %v1421_v21 = vld [vmem:[%s4027_s6 + $0x1d0] sm:$0xff] }
 0x635   :  { %2748 = vmatprep.subr.bf16.mxu0 %v2747_v11  ;;  %v2787_v10 = vpack.c.bf16 %v1422_v20, %v1421_v21  ;;  %v1405_v11 = vld [vmem:[%s4027_s6 + $0x150] sm:$0xff] }
 0x636   :  { %1251 = vmatmul.mubr.f32.gmra.mrb[16].mxu1 %v1024_v42  ;;  %v1387_v42 = vld [vmem:[%s4027_s6 + $0xc0] sm:$0xff]  ;;  %v2789_v13 = vpack.c.bf16 %v1406_v12, %v1405_v11 }
 0x637   :  { %1256 = vmatprep.mubr.f32.mxu1 %v3005_v40  ;;  %v2751_v48 = vpack.c.bf16 %v1388_v44, %v1387_v42  ;;  %2774 = vmatpush3.bf16.msra.mxu1 %v2773_v53  ;;  %v1424_v42 = vld [vmem:[%s4027_s6 + $0x1e8] sm:$0xff] }
 0x638   :  { %2750 = vmatpush3.bf16.msra.mxu0 %v2749_v14  ;;  %2776 = vmatprep.subr.bf16.mxu1 %v2775_v58  ;;  %v1423_v14 = vld [vmem:[%s4027_s6 + $0x1e0] sm:$0xff] }
 0x639   :  { %2752 = vmatprep.subr.bf16.mxu0 %v2751_v48  ;;  %v2791_v44 = vpack.c.bf16 %v1424_v42, %v1423_v14  ;;  %v1407_v48 = vld [vmem:[%s4027_s6 + $0x160] sm:$0xff] }
 0x63a   :  { %1257 = vmatmul.mubr.f32.gmra.mrb[18].mxu1 %v1025_v18  ;;  %v1390_v18 = vld [vmem:[%s4027_s6 + $0xd8] sm:$0xff]  ;;  %v2793_v0 = vpack.c.bf16 %v1408_v49, %v1407_v48 }
 0x63b   :  { %1262 = vmatprep.mubr.f32.mxu1 %v3005_v40  ;;  %v2755_v19 = vpack.c.bf16 %v1390_v18, %v1389_v54  ;;  %2778 = vmatpush3.bf16.msra.mxu1 %v2777_v61  ;;  %v1426_v54 = vld [vmem:[%s4027_s6 + $0x1f8] sm:$0xff]  ;;  %v1409_v18 = vld [vmem:[%s4027_s6 + $0x170] sm:$0xff] }
 0x63c   :  { %2754 = vmatpush3.bf16.msra.mxu0 %v2753_v16  ;;  %2780 = vmatprep.subr.bf16.mxu1 %v2779_v1  ;;  %v1425_v16 = vld [vmem:[%s4027_s6 + $0x1f0] sm:$0xff]  ;;  %v2797_v23 = vpack.c.bf16 %v1410_v22, %v1409_v18 }
 0x63d   :  { %2756 = vmatprep.subr.bf16.mxu0 %v2755_v19  ;;  %v2795_v19 = vpack.c.bf16 %v1426_v54, %v1425_v16 }
 0x63e   :  { %1263 = vmatmul.mubr.f32.gmra.mrb[20].mxu1 %v1026_v27  ;;  %v2759_v27 = vpack.c.bf16 %v1392_v26, %v1391_v25 }
 0x63f   :  { %2782 = vmatpush3.bf16.msra.mxu1 %v2781_v4 }
 0x640   :  { %2758 = vmatpush3.bf16.msra.mxu0 %v2757_v24  ;;  %2784 = vmatprep.subr.bf16.mxu1 %v2783_v7 }
 0x641   :  { %2760 = vmatprep.subr.bf16.mxu0 %v2759_v27 }
 0x643   :  { %2786 = vmatpush3.bf16.msra.mxu1 %v2785_v15 }
 0x644   :  { %2762 = vmatpush3.bf16.msra.mxu0 %v2761_v30  ;;  %2788 = vmatprep.subr.bf16.mxu1 %v2787_v10 }
 0x645   :  { %2764 = vmatprep.subr.bf16.mxu0 %v2763_v34 }
 0x647   :  { %2790 = vmatpush3.bf16.msra.mxu1 %v2789_v13 }
 0x648   :  { %2766 = vmatpush3.bf16.msra.mxu0 %v2765_v36  ;;  %2792 = vmatprep.subr.bf16.mxu1 %v2791_v44 }
 0x64b   :  { %2794 = vmatpush3.bf16.msra.mxu1 %v2793_v0 }
 0x64c   :  { %2796 = vmatprep.subr.bf16.mxu1 %v2795_v19 }
 0x64f   :  { %2798 = vmatpush3.bf16.msra.mxu1 %v2797_v23 }
 0x6e5   :  { %v3759_v24 = vpop.f32.mrb[6].mxu1 }
 0x6e6   :  { %v3761_v25 = vpop.f32.mrb[7].mxu1  ;;  %v1307_v27 = vmul.f32 %v3759_v24, %v3759_v24 }
 0x6e7   :  { %v1308_v31 = vmul.f32 %v3761_v25, %v3761_v25 }
 0x6e9   :  { %v3763_v26 = vpop.f32.mrb[8].mxu1 }
 0x6ea   :  { %v1271_v28 = vadd.f32 %v3763_v26, %v3759_v24  ;;  %v1311_v29 = vmul.f32 %v3763_v26, %v3763_v26  ;;  %v3771_v30 = vpop.f32.mrb[9].mxu1 }
 0x6eb   :  { %v1280_v32 = vadd.f32 %v3771_v30, %v3761_v25  ;;  %v1312_v33 = vmul.f32 %v3771_v30, %v3771_v30 }
 0x6ec   :  { %v1323_v34 = vadd.f32 %v1311_v29, %v1307_v27 }
 0x6ed   :  { %v1332_v35 = vadd.f32 %v1312_v33, %v1308_v31  ;;  %v3779_v36 = vpop.f32.mrb[10].mxu1 }
 0x6ee   :  { %v1272_v37 = vadd.f32 %v1271_v28, %v3779_v36  ;;  %v1315_v38 = vmul.f32 %v3779_v36, %v3779_v36  ;;  %v3784_v39 = vpop.f32.mrb[11].mxu1 }
 0x6ef   :  { %v1281_v41 = vadd.f32 %v1280_v32, %v3784_v39  ;;  %v1316_v43 = vmul.f32 %v3784_v39, %v3784_v39 }
 0x6f0   :  { %v1324_v45 = vadd.f32 %v1323_v34, %v1315_v38 }
 0x6f1   :  { %v1333_v46 = vadd.f32 %v1332_v35, %v1316_v43  ;;  %v3789_v47 = vpop.f32.mrb[12].mxu1 }
 0x6f2   :  { %v1273_v50 = vadd.f32 %v1272_v37, %v3789_v47  ;;  %v1319_v51 = vmul.f32 %v3789_v47, %v3789_v47  ;;  %v3794_v52 = vpop.f32.mrb[13].mxu1 }
 0x6f3   :  { %v1282_v53 = vadd.f32 %v1281_v41, %v3794_v52  ;;  %v1320_v57 = vmul.f32 %v3794_v52, %v3794_v52 }
 0x6f4   :  { %v1274_v6 = vrot.slane %v1273_v50, 4  ;;  %v1325_v58 = vadd.f32 %v1324_v45, %v1319_v51 }
 0x6f5   :  { %v1283_v59 = vrot.slane %v1282_v53, 4  ;;  %v1334_v60 = vadd.f32 %v1333_v46, %v1320_v57 }
 0x6f6   :  { %v1275_v61 = vadd.f32 %v1274_v6, %v1273_v50  ;;  %v1326_v62 = vrot.slane %v1325_v58, 4 }
 0x6f7   :  { %v1284_v63 = vadd.f32 %v1283_v59, %v1282_v53  ;;  %v1335_v1 = vrot.slane %v1334_v60, 4 }
 0x6f8   :  { %v1276_v2 = vrot.slane %v1275_v61, 2  ;;  %v1327_v3 = vadd.f32 %v1326_v62, %v1325_v58 }
 0x6f9   :  { %v1285_v4 = vrot.slane %v1284_v63, 2  ;;  %v1336_v17 = vadd.f32 %v1335_v1, %v1334_v60 }
 0x6fa   :  { %v1277_v5 = vadd.f32 %v1276_v2, %v1275_v61  ;;  %v1328_v7 = vrot.slane %v1327_v3, 2 }
 0x6fb   :  { %v1286_v8 = vadd.f32 %v1285_v4, %v1284_v63  ;;  %v1337_v9 = vrot.slane %v1336_v17, 2 }
 0x6fc   :  { %v1278_v15 = vrot.slane %v1277_v5, 1  ;;  %v1329_v21 = vadd.f32 %v1328_v7, %v1327_v3 }
 0x6fd   :  { %v1287_v20 = vrot.slane %v1286_v8, 1  ;;  %v1338_v10 = vadd.f32 %v1337_v9, %v1336_v17 }
 0x6fe   :  { %v1330_v11 = vrot.slane %v1329_v21, 1  ;;  %v1279_v13 = vadd.f32 %v1278_v15, %v1277_v5 }
 0x6ff   :  { %v1339_v12 = vrot.slane %v1338_v10, 1  ;;  %v1288_v42 = vadd.f32 %v1287_v20, %v1286_v8 }
 0x700   :  { %v1331_v14 = vadd.f32 %v1330_v11, %v1329_v21 }
 0x701   :  { %v1340_v44 = vadd.f32 %v1339_v12, %v1338_v10 }
 0x702   :  { %v1359_v48 = vsel %vm228_vm2, %v1279_v13, %v1331_v14 }
 0x703   :  { %v1360_v49 = vsel %vm228_vm2, %v1288_v42, %v1340_v44 }
 0x704   :  { %1491 = vmatprep.mubr.f32.mxu0 %v1360_v49 }
 0x705   :  { %v3801_v0 = vpop.f32.mrb[14].mxu1  ;;  %1492 = vmatmul.mubr.f32.vlgmr.msra.gmra.mrb[10].mxu0 %v1359_v48 }
 0x706   :  { %v3803_v16 = vpop.f32.mrb[15].mxu1  ;;  %1668 = vmatprep.mubr.f32.mxu0 %v3005_v40  ;;  %v1309_v18 = vmul.f32 %v3801_v0, %v3801_v0 }
 0x707   :  { %v1310_v27 = vmul.f32 %v3803_v16, %v3803_v16 }
 0x709   :  { %v3806_v54 = vpop.f32.mrb[16].mxu1 }
 0x70a   :  { %v1289_v19 = vadd.f32 %v3806_v54, %v3801_v0  ;;  %v1313_v22 = vmul.f32 %v3806_v54, %v3806_v54  ;;  %v3814_v23 = vpop.f32.mrb[17].mxu1 }
 0x70b   :  { %v1298_v28 = vadd.f32 %v3814_v23, %v3803_v16  ;;  %v1314_v29 = vmul.f32 %v3814_v23, %v3814_v23 }
 0x70c   :  { %v1341_v31 = vadd.f32 %v1313_v22, %v1309_v18  ;;  %v1815_v22 = vld [vmem:[%s4031_s10 + $0x28] sm:$0xff] }
 0x70d   :  { %v1350_v32 = vadd.f32 %v1314_v29, %v1310_v27  ;;  %v3822_v33 = vpop.f32.mrb[18].mxu1  ;;  %v1814_v29 = vld [vmem:[%s4031_s10 + $0x20] sm:$0xff] }
 0x70e   :  { %v1290_v34 = vadd.f32 %v1289_v19, %v3822_v33  ;;  %v1317_v35 = vmul.f32 %v3822_v33, %v3822_v33  ;;  %v3827_v37 = vpop.f32.mrb[19].mxu1  ;;  %v1811_v19 = vld [vmem:[%s4031_s10 + $0x8] sm:$0xff] }
 0x70f   :  { %v1299_v38 = vadd.f32 %v1298_v28, %v3827_v37  ;;  %v1318_v41 = vmul.f32 %v3827_v37, %v3827_v37  ;;  %v2815_v27 = vpack.c.bf16 %v1815_v22, %v1811_v19  ;;  %v1810_v28 = vld [vmem:[%s4031_s10] sm:$0xff] }
 0x710   :  { %v1342_v43 = vadd.f32 %v1341_v31, %v1317_v35  ;;  %v2817_v31 = vpack.c.bf16 %v1814_v29, %v1810_v28 }
 0x711   :  { %v1351_v45 = vadd.f32 %v1350_v32, %v1318_v41  ;;  %v3832_v46 = vpop.f32.mrb[20].mxu1  ;;  %2816 = vmatprep.subr.bf16.mxu1 %v2815_v27  ;;  %v1819_v32 = vld [vmem:[%s4031_s10 + $0x48] sm:$0xff]  ;;  %v1822_v41 = vld [vmem:[%s4031_s10 + $0x60] sm:$0xff] }
 0x712   :  { %v1291_v50 = vadd.f32 %v1290_v34, %v3832_v46  ;;  %v1321_v51 = vmul.f32 %v3832_v46, %v3832_v46  ;;  %v3837_v53 = vpop.f32.mrb[21].mxu1  ;;  %v1823_v34 = vld [vmem:[%s4031_s10 + $0x68] sm:$0xff] }
 0x713   :  { %v1300_v57 = vadd.f32 %v1299_v38, %v3837_v53  ;;  %v1322_v6 = vmul.f32 %v3837_v53, %v3837_v53  ;;  %v2819_v35 = vpack.c.bf16 %v1823_v34, %v1819_v32  ;;  %v1818_v38 = vld [vmem:[%s4031_s10 + $0x40] sm:$0xff] }
 0x714   :  { %v1292_v58 = vrot.slane %v1291_v50, 4  ;;  %v1343_v59 = vadd.f32 %v1342_v43, %v1321_v51  ;;  %v2821_v43 = vpack.c.bf16 %v1822_v41, %v1818_v38  ;;  %v1269_v41 = vld [vmem:[%s4030_s9] sm:$0x1] }
 0x715   :  { %v1301_v60 = vrot.slane %v1300_v57, 4  ;;  %v1352_v61 = vadd.f32 %v1351_v45, %v1322_v6  ;;  %v1827_v45 = vld [vmem:[%s4031_s10 + $0x88] sm:$0xff]  ;;  %v1830_v6 = vld [vmem:[%s4031_s10 + $0xa0] sm:$0xff] }
 0x716   :  { %v1293_v62 = vadd.f32 %v1292_v58, %v1291_v50  ;;  %v1344_v63 = vrot.slane %v1343_v59, 4  ;;  %v1831_v50 = vld [vmem:[%s4031_s10 + $0xa8] sm:$0xff] }
 0x717   :  { %v1302_v1 = vadd.f32 %v1301_v60, %v1300_v57  ;;  %v1353_v2 = vrot.slane %v1352_v61, 4  ;;  %v2823_v51 = vpack.c.bf16 %v1831_v50, %v1827_v45  ;;  %v1826_v57 = vld [vmem:[%s4031_s10 + $0x80] sm:$0xff]  ;;  %v1839_v60 = vld [vmem:[%s4031_s10 + $0xe8] sm:$0xff] }
 0x718   :  { %v1294_v3 = vrot.slane %v1293_v62, 2  ;;  %v1345_v4 = vadd.f32 %v1344_v63, %v1343_v59  ;;  %v2825_v58 = vpack.c.bf16 %v1830_v6, %v1826_v57  ;;  %v1835_v59 = vld [vmem:[%s4031_s10 + $0xc8] sm:$0xff]  ;;  %v1270_v50 = vld [vmem:[%s4030_s9 + $0x1] sm:$0x1]  ;;  %v1586_v57 = vld [vmem:[#allocation8 + $0x10] sm:$0xff] }
 0x719   :  { %v1303_v17 = vrot.slane %v1302_v1, 2  ;;  %v1354_v5 = vadd.f32 %v1353_v2, %v1352_v61  ;;  %v2827_v61 = vpack.c.bf16 %v1839_v60, %v1835_v59  ;;  %v1589_v63 = vld [vmem:[#allocation8 + $0x28] sm:$0xff]  ;;  %v1590_v6 = vld [vmem:[#allocation8 + $0x30] sm:$0xff]  ;;  %v1595_v59 = vld [vmem:[#allocation8 + $0x58] sm:$0xff] }
 0x71a   :  { %v1295_v7 = vadd.f32 %v1294_v3, %v1293_v62  ;;  %v1346_v8 = vrot.slane %v1345_v4, 2  ;;  %v1585_v62 = vld [vmem:[#allocation8 + $0x8] sm:$0xff]  ;;  %v1838_v3 = vld [vmem:[%s4031_s10 + $0xe0] sm:$0xff]  ;;  %v1599_v60 = vld [vmem:[#allocation8 + $0x78] sm:$0xff] }
 0x71b   :  { %v1304_v9 = vadd.f32 %v1303_v17, %v1302_v1  ;;  %v1355_v15 = vrot.slane %v1354_v5, 2  ;;  %v1834_v1 = vld [vmem:[%s4031_s10 + $0xc0] sm:$0xff]  ;;  %v2799_v2 = vpack.c.bf16 %v1589_v63, %v1585_v62  ;;  %v2809_v62 = vpack.c.bf16 %v1590_v6, %v1586_v57 }
 0x71c   :  { %v1296_v21 = vrot.slane %v1295_v7, 1  ;;  %v1347_v20 = vadd.f32 %v1346_v8, %v1345_v4  ;;  %v1584_v4 = vld [vmem:[#allocation8] sm:$0xff]  ;;  %v1593_v8 = vld [vmem:[#allocation8 + $0x48] sm:$0xff]  ;;  %v2811_v63 = vpack.c.bf16 %v1599_v60, %v1595_v59 }
 0x71d   :  { %v1305_v10 = vrot.slane %v1304_v9, 1  ;;  %v1356_v11 = vadd.f32 %v1355_v15, %v1354_v5  ;;  %v1588_v17 = vld [vmem:[#allocation8 + $0x20] sm:$0xff]  ;;  %v2829_v5 = vpack.c.bf16 %v1838_v3, %v1834_v1  ;;  %2800 = vmatprep.subr.bf16.mxu0 %v2799_v2  ;;  %v1594_v1 = vld [vmem:[#allocation8 + $0x50] sm:$0xff] }
 0x71e   :  { %v1348_v12 = vrot.slane %v1347_v20, 1  ;;  %v1297_v14 = vadd.f32 %v1296_v21, %v1295_v7  ;;  %v2801_v7 = vpack.c.bf16 %v1588_v17, %v1584_v4  ;;  %v1592_v21 = vld [vmem:[#allocation8 + $0x40] sm:$0xff]  ;;  %v1598_v2 = vld [vmem:[#allocation8 + $0x70] sm:$0xff]  ;;  %v1813_v4 = vld [vmem:[%s4031_s10 + $0x18] sm:$0xff] }
 0x71f   :  { %v1357_v13 = vrot.slane %v1356_v11, 1  ;;  %v1306_v44 = vadd.f32 %v1305_v10, %v1304_v9  ;;  %v1597_v9 = vld [vmem:[#allocation8 + $0x68] sm:$0xff]  ;;  %v1817_v17 = vld [vmem:[%s4031_s10 + $0x38] sm:$0xff] }
 0x720   :  { %v1349_v42 = vadd.f32 %v1348_v12, %v1347_v20  ;;  %2802 = vmatpush1.bf16.msra.mxu0 %v2801_v7  ;;  %v2803_v15 = vpack.c.bf16 %v1597_v9, %v1593_v8  ;;  %v1596_v20 = vld [vmem:[#allocation8 + $0x60] sm:$0xff]  ;;  %v1587_v12 = vld [vmem:[#allocation8 + $0x18] sm:$0xff]  ;;  %v2831_v7 = vpack.c.bf16 %v1817_v17, %v1813_v4  ;;  %v1812_v8 = vld [vmem:[%s4031_s10 + $0x10] sm:$0xff] }
 0x721   :  { %v1358_v48 = vadd.f32 %v1357_v13, %v1356_v11  ;;  %v2805_v10 = vpack.c.bf16 %v1596_v20, %v1592_v21  ;;  %v3893_v11 = vld [vmem:[#allocation2] sm:$0xff]  ;;  %v1591_v13 = vld [vmem:[#allocation8 + $0x38] sm:$0xff]  ;;  %v1816_v9 = vld [vmem:[%s4031_s10 + $0x30] sm:$0xff] }
 0x722   :  { %v1361_v49 = vsel %vm228_vm2, %v1297_v14, %v1349_v42  ;;  %2804 = vmatprep.subr.bf16.mxu0 %v2803_v15  ;;  %v2807_v14 = vpack.c.bf16 %v1591_v13, %v1587_v12  ;;  %v3898_v42 = vld [vmem:[#allocation2 + $0x8] sm:$0xff]  ;;  %v1821_v15 = vld [vmem:[%s4031_s10 + $0x58] sm:$0xff]  ;;  %v2833_v20 = vpack.c.bf16 %v1816_v9, %v1812_v8  ;;  %v1820_v12 = vld [vmem:[%s4031_s10 + $0x50] sm:$0xff] }
 0x723   :  { %v1362_v18 = vsel %vm228_vm2, %v1306_v44, %v1358_v48  ;;  %v3903_v44 = vld [vmem:[#allocation2 + $0x10] sm:$0xff]  ;;  %v3908_v48 = vld [vmem:[#allocation2 + $0x18] sm:$0xff] }
 0x724   :  { %1561 = vmatprep.mubr.f32.mxu1 %v1362_v18  ;;  %2806 = vmatpush1.bf16.msra.mxu0 %v2805_v10  ;;  %v1825_v21 = vld [vmem:[%s4031_s10 + $0x78] sm:$0xff]  ;;  %v1824_v13 = vld [vmem:[%s4031_s10 + $0x70] sm:$0xff] }
 0x725   :  { %1562 = vmatmul.mubr.f32.vlgmr.msra.gmra.mrb[22].mxu1 %v1361_v49  ;;  %2808 = vmatprep.subr.bf16.mxu0 %v2807_v14  ;;  %v2835_v10 = vpack.c.bf16 %v1825_v21, %v1821_v15  ;;  %v1829_v14 = vld [vmem:[%s4031_s10 + $0x98] sm:$0xff] }
 0x726   :  { %1906 = vmatprep.mubr.f32.mxu1 %v3005_v40  ;;  %2818 = vmatpush1.bf16.msra.mxu1 %v2817_v31 }
 0x727   :  { %2820 = vmatprep.subr.bf16.mxu1 %v2819_v35 }
 0x72a   :  { %2822 = vmatpush1.bf16.msra.mxu1 %v2821_v43 }
 0x72b   :  { %2824 = vmatprep.subr.bf16.mxu1 %v2823_v51 }
 0x72e   :  { %2826 = vmatpush1.bf16.msra.mxu1 %v2825_v58 }
 0x72f   :  { %2828 = vmatprep.subr.bf16.mxu1 %v2827_v61 }
 0x732   :  { %2830 = vmatpush1.bf16.msra.mxu1 %v2829_v5  ;;  %v2813_v5 = vpack.c.bf16 %v1598_v2, %v1594_v1 }
 0x735   :  { %2103 = vmatmul.mubr.msk.f32.vlgmr.msra.gmra.mrb[24].mxu1 %vm106_vm0, %v3893_v11 }
 0x736   :  { %1912 = vmatprep.mubr.f32.mxu1 %v3005_v40 }
 0x739   :  { %2104 = vmatmul.mubr.msk.f32.gmra.mrb[26].mxu1 %vm106_vm0, %v3898_v42 }
 0x73a   :  { %1918 = vmatprep.mubr.f32.mxu1 %v3005_v40 }
 0x73d   :  { %2105 = vmatmul.mubr.msk.f32.gmra.mrb[28].mxu1 %vm106_vm0, %v3903_v44 }
 0x73e   :  { %1924 = vmatprep.mubr.f32.mxu1 %v3005_v40 }
 0x741   :  { %2106 = vmatmul.mubr.msk.f32.gmra.mrb[30].mxu1 %vm106_vm0, %v3908_v48 }
 0x7d8   :  { %v2257_v49 = vpop.f32.mrb[10].mxu0 }
 0x7d9   :  { %v2258_v18 = vpop.f32.mrb[11].mxu0 }
 0x7da   :  { %v2259_v19 = vadd.f32 %v2258_v18, %v2257_v49  ;;  %v1833_v49 = vld [vmem:[%s4031_s10 + $0xb8] sm:$0xff]  ;;  %v2837_v18 = vpack.c.bf16 %v1824_v13, %v1820_v12 }
 0x7f8   :  { %v2292_v22 = vpop.f32.mrb[22].mxu1 }
 0x7f9   :  { %v2293_v27 = vpop.f32.mrb[23].mxu1 }
 0x7fa   :  { %v2294_v28 = vadd.f32 %v2293_v27, %v2292_v22  ;;  %v1828_v22 = vld [vmem:[%s4031_s10 + $0x90] sm:$0xff] }
 0x7fb   :  { %v1832_v27 = vld [vmem:[%s4031_s10 + $0xb0] sm:$0xff] }
 0x7fc   :  { %v1564_v29 = vadd.f32 %v2294_v28, %v2259_v19  ;;  %v2839_v19 = vpack.c.bf16 %v1833_v49, %v1829_v14  ;;  %v1837_v28 = vld [vmem:[%s4031_s10 + $0xd8] sm:$0xff] }
 0x7fe   :  { %v1567_v31 = vmul.f32 %v1564_v29, %v1564_v29 }
 0x800   :  { %v1569_v32 = vrot.slane %v1567_v31, 7  ;;  %v2841_v31 = vpack.c.bf16 %v1832_v27, %v1828_v22 }
 0x802   :  { %v1571_v34 = vsub.f32 %v1564_v29, %v1569_v32 }
 0x804   :  { %v1572_v35 = vadd.f32 1e-05, %v1571_v34  ;;  %v1836_v34 = vld [vmem:[%s4031_s10 + $0xd0] sm:$0xff] }
 0x806   :  { %2871 = vrsqrt.f32 %v1572_v35  ;;  %v1840_v35 = vld [vmem:[%s4031_s10 + $0xf0] sm:$0xff] }
 0x810   :  { %v2872_v38 = vpop.eup %2871 }
 0x811   :  { %v1575_v43 = vrot.slane %v2872_v38, 1  ;;  %v2845_v38 = vpack.c.bf16 %v1840_v35, %v1836_v34 }
 0x813   :  { %v1577_v45 = vmul.f32 %v1575_v43, %v1269_v41  ;;  %v1908_v41 = vpop.f32.mrb[24].mxu1 }
 0x814   :  { %v1910_v43 = vpop.f32.mrb[25].mxu1 }
 0x815   :  { %v1578_v51 = vmul.f32 %v1577_v45, %v1564_v29  ;;  %v1841_v29 = vld [vmem:[%s4031_s10 + $0xf8] sm:$0xff]  ;;  %s3006_s10 = smov [#allocation10]  }
 0x816   :  { %v2843_v32 = vpack.c.bf16 %v1841_v29, %v1837_v28  ;;  %s2073_s28 = sshll.u32 %s3006_s10, 4  ;;  %s2074_s28 = int_to_ptr.vmem [resolvable:$true] %s2073_s28 }
 0x817   :  { %v1579_v58 = vsub.f32 %v1270_v50, %v1578_v51  ;;  %s2965_s30 = scalar_lea.vmem %s2074_s28, 2048  ;;  %p2970_p5 = scmp.lt.s32.totalorder %s2074_s28, %s2074_s28 }
 0x818   :  { %p2966_p4 = scmp.ne.s32.totalorder %s2074_s28, %s2965_s30  ;;  %p2971_p6 = scmp.lt.s32.totalorder %s2965_s30, %s2965_s30 }
 0x819   :  { %v1581_v61 = vrot.slane %v1579_v58, 7 }
 0x81a   :  { %p2972_p7 = por %p2971_p6, %p2970_p5 }
 0x81b   :  { %v1583_v3 = vsel %vm228_vm2, %v1577_v45, %v1581_v61  ;;  %v1914_v45 = vpop.f32.mrb[26].mxu1 }
 0x81c   :  { %2101 = vmatmul.mubr.msk.f32.vlgmr.msra.gmra.mrb[12].mxu0 %vm1600_vm10, %v1583_v3  ;;  %v1916_v50 = vpop.f32.mrb[27].mxu1  ;;  %p2973_p8 = pnand %p2972_p7, %p2966_p4 }
 0x81d   :  { %2810 = vmatpush1.bf16.msra.mxu0 %v2809_v62  ;;  %1739 = vmatprep.mubr.f32.mxu0 %v3005_v40 }
 0x81e   :  { %2812 = vmatprep.subr.bf16.mxu0 %v2811_v63 }
 0x821   :  { %2814 = vmatpush1.bf16.msra.mxu0 %v2813_v5 }
 0x822   :  { %2832 = vmatprep.subr.bf16.mxu0 %v2831_v7 }
 0x824   :  { %2102 = vmatmul.mubr.msk.f32.vlgmr.msra.gmra.mrb[14].mxu0 %vm1600_vm10, %v1583_v3 }
 0x825   :  { %2834 = vmatpush1.bf16.msra.mxu0 %v2833_v20  ;;  %1995 = vmatprep.mubr.f32.mxu0 %v3005_v40 }
 0x826   :  { %2836 = vmatprep.subr.bf16.mxu0 %v2835_v10 }
 0x829   :  { %2838 = vmatpush1.bf16.msra.mxu0 %v2837_v18 }
 0x82a   :  { %2840 = vmatprep.subr.bf16.mxu0 %v2839_v19 }
 0x82d   :  { %2842 = vmatpush1.bf16.msra.mxu0 %v2841_v31 }
 0x82e   :  { %2844 = vmatprep.subr.bf16.mxu0 %v2843_v32 }
 0x831   :  { %2846 = vmatpush1.bf16.msra.mxu0 %v2845_v38 }
 0x834   :  { %2107 = vmatmul.mubr.msk.f32.vlgmr.msra.gmra.mrb[16].mxu0 %vm106_vm0, %v3893_v11  ;;  %v1920_v11 = vpop.f32.mrb[28].mxu1 }
 0x835   :  { %2001 = vmatprep.mubr.f32.mxu0 %v3005_v40  ;;  %v1922_v51 = vpop.f32.mrb[29].mxu1 }
 0x836   :  { %v1926_v57 = vpop.f32.mrb[30].mxu1 }
 0x837   :  { %v1928_v6 = vpop.f32.mrb[31].mxu1 }
 0x838   :  { %2108 = vmatmul.mubr.msk.f32.gmra.mrb[18].mxu0 %vm106_vm0, %v3898_v42 }
 0x839   :  { %2007 = vmatprep.mubr.f32.mxu0 %v3005_v40 }
 0x83c   :  { %2109 = vmatmul.mubr.msk.f32.gmra.mrb[20].mxu0 %vm106_vm0, %v3903_v44 }
 0x83d   :  { %2013 = vmatprep.mubr.f32.mxu0 %v3005_v40 }
 0x840   :  { %2110 = vmatmul.mubr.msk.f32.gmra.mrb[22].mxu0 %vm106_vm0, %v3908_v48 }
 0x8ef   :  { %v1670_v58 = vpop.f32.mrb[12].mxu0 }
 0x8f0   :  { %v1749_v42 = vrot.slane %v1670_v58, %v3271_v55  ;;  %v1672_v59 = vpop.f32.mrb[13].mxu0  ;;  %v1781_v60 = vrot.slane %v1670_v58, %v3274_v56 }
 0x8f1   :  { %v1753_v44 = vrot.slane %v1672_v59, %v3271_v55  ;;  %v1785_v40 = vrot.slane %v1672_v59, %v3274_v56 }
 0x8f2   :  { %v1762_v48 = vmul.f32 %v1749_v42, %v3759_v24  ;;  %v1766_v61 = vmul.f32 %v1749_v42, %v3763_v26  ;;  %v1770_v62 = vmul.f32 %v1749_v42, %v3779_v36  ;;  %v1774_v63 = vmul.f32 %v1749_v42, %v3789_v47 }
 0x8f3   :  { %v1763_v1 = vmul.f32 %v1753_v44, %v3761_v25  ;;  %v1767_v2 = vmul.f32 %v1753_v44, %v3771_v30  ;;  %v1771_v3 = vmul.f32 %v1753_v44, %v3784_v39  ;;  %v1775_v4 = vmul.f32 %v1753_v44, %v3794_v52 }
 0x8f4   :  { %v1794_v17 = vadd.f32 %v1781_v60, %v1762_v48  ;;  %v1798_v5 = vadd.f32 %v1781_v60, %v1766_v61  ;;  %v1802_v7 = vadd.f32 %v1781_v60, %v1770_v62  ;;  %v1806_v8 = vadd.f32 %v1781_v60, %v1774_v63 }
 0x8f5   :  { %v1795_v9 = vadd.f32 %v1785_v40, %v1763_v1  ;;  %v1799_v24 = vadd.f32 %v1785_v40, %v1767_v2  ;;  %v1803_v15 = vadd.f32 %v1785_v40, %v1771_v3  ;;  %v1807_v26 = vadd.f32 %v1785_v40, %v1775_v4 }
 0x8f6   :  { %v2020_v21 = vadd.f32 %v1908_v41, %v1794_v17  ;;  %v2024_v36 = vadd.f32 %v1914_v45, %v1798_v5  ;;  %v2028_v20 = vadd.f32 %v1920_v11, %v1802_v7  ;;  %v2032_v47 = vadd.f32 %v1926_v57, %v1806_v8 }
 0x8f7   :  { %v2021_v10 = vadd.f32 %v1910_v43, %v1795_v9  ;;  %v2025_v25 = vadd.f32 %v1916_v50, %v1799_v24  ;;  %v2029_v12 = vadd.f32 %v1922_v51, %v1803_v15  ;;  %v1741_v30 = vpop.f32.mrb[14].mxu0  ;;  %v2033_v13 = vadd.f32 %v1928_v6, %v1807_v26 }
 0x8f8   :  { %v2036_v39 = vmax.f32 %v2020_v21, 0.0  ;;  %v2040_v14 = vmax.f32 %v2024_v36, 0.0  ;;  %v2044_v52 = vmax.f32 %v2028_v20, 0.0  ;;  %v2048_v49 = vmax.f32 %v2032_v47, 0.0  ;;  %v1743_v18 = vpop.f32.mrb[15].mxu0 }
 0x8f9   :  { %v2037_v19 = vmax.f32 %v2021_v10, 0.0  ;;  %v2041_v22 = vmax.f32 %v2025_v25, 0.0  ;;  %v2045_v27 = vmax.f32 %v2029_v12, 0.0  ;;  %v1757_v28 = vrot.slane %v1741_v30, %v3271_v55 }
 0x8fa   :  { %2052 = vst [vmem:[#allocation10] sm:$0xff] %v2036_v39  ;;  %2056 = vst [vmem:[#allocation10 + $0x20] sm:$0xff] %v2040_v14  ;;  %v1789_v29 = vrot.slane %v1741_v30, %v3274_v56  ;;  %v2049_v31 = vmax.f32 %v2033_v13, 0.0  ;;  %v1761_v32 = vrot.slane %v1743_v18, %v3271_v55  ;;  %v1793_v34 = vrot.slane %v1743_v18, %v3274_v56 }
 0x8fb   :  { %2060 = vst [vmem:[#allocation10 + $0x40] sm:$0xff] %v2044_v52  ;;  %2064 = vst [vmem:[#allocation10 + $0x60] sm:$0xff] %v2048_v49  ;;  %v1764_v35 = vmul.f32 %v1757_v28, %v3801_v0  ;;  %v1768_v38 = vmul.f32 %v1757_v28, %v3806_v54  ;;  %v1772_v41 = vmul.f32 %v1757_v28, %v3822_v33 }
 0x8fc   :  { %2053 = vst [vmem:[#allocation10 + $0x8] sm:$0xff] %v2037_v19  ;;  %2057 = vst [vmem:[#allocation10 + $0x28] sm:$0xff] %v2041_v22  ;;  %v1776_v43 = vmul.f32 %v1757_v28, %v3832_v46  ;;  %v1765_v45 = vmul.f32 %v1761_v32, %v3803_v16  ;;  %v1769_v50 = vmul.f32 %v1761_v32, %v3814_v23 }
 0x8fd   :  { %2061 = vst [vmem:[#allocation10 + $0x48] sm:$0xff] %v2045_v27  ;;  %2065 = vst [vmem:[#allocation10 + $0x68] sm:$0xff] %v2049_v31  ;;  %v1773_v55 = vmul.f32 %v1761_v32, %v3827_v37  ;;  %v1777_v56 = vmul.f32 %v1761_v32, %v3837_v53  ;;  %v1796_v11 = vadd.f32 %v1789_v29, %v1764_v35 }
 0x8fe   :  { %v1800_v51 = vadd.f32 %v1789_v29, %v1768_v38  ;;  %v1804_v57 = vadd.f32 %v1789_v29, %v1772_v41  ;;  %v1808_v6 = vadd.f32 %v1789_v29, %v1776_v43  ;;  %v1797_v0 = vadd.f32 %v1793_v34, %v1765_v45 }
 0x8ff   :  { %v1801_v58 = vadd.f32 %v1793_v34, %v1769_v50  ;;  %v1805_v54 = vadd.f32 %v1793_v34, %v1773_v55  ;;  %v1809_v42 = vadd.f32 %v1793_v34, %v1777_v56 }
 0x907   :  { %v1997_v33 = vpop.f32.mrb[16].mxu0 }
 0x908   :  { %v2022_v59 = vadd.f32 %v1997_v33, %v1796_v11  ;;  %v1999_v46 = vpop.f32.mrb[17].mxu0 }
 0x909   :  { %v2023_v60 = vadd.f32 %v1999_v46, %v1797_v0 }
 0x90a   :  { %v2038_v44 = vmax.f32 %v2022_v59, 0.0 }
 0x90b   :  { %v2039_v16 = vmax.f32 %v2023_v60, 0.0  ;;  %v2003_v40 = vpop.f32.mrb[18].mxu0 }
 0x90c   :  { %2054 = vst [vmem:[#allocation10 + $0x10] sm:$0xff] %v2038_v44  ;;  %v2026_v23 = vadd.f32 %v2003_v40, %v1800_v51  ;;  %v2005_v37 = vpop.f32.mrb[19].mxu0 }
 0x90d   :  { %2055 = vst [vmem:[#allocation10 + $0x18] sm:$0xff] %v2039_v16  ;;  %v2027_v53 = vadd.f32 %v2005_v37, %v1801_v58 }
 0x90e   :  { %v2042_v48 = vmax.f32 %v2026_v23, 0.0 }
 0x90f   :  { %v2043_v61 = vmax.f32 %v2027_v53, 0.0  ;;  %v2009_v62 = vpop.f32.mrb[20].mxu0 }
 0x910   :  { %2058 = vst [vmem:[#allocation10 + $0x30] sm:$0xff] %v2042_v48  ;;  %v2030_v63 = vadd.f32 %v2009_v62, %v1804_v57  ;;  %v2011_v1 = vpop.f32.mrb[21].mxu0 }
 0x911   :  { %2059 = vst [vmem:[#allocation10 + $0x38] sm:$0xff] %v2043_v61  ;;  %v2031_v2 = vadd.f32 %v2011_v1, %v1805_v54 }
 0x912   :  { %v2046_v3 = vmax.f32 %v2030_v63, 0.0 }
 0x913   :  { %v2047_v4 = vmax.f32 %v2031_v2, 0.0  ;;  %v2015_v17 = vpop.f32.mrb[22].mxu0 }
 0x914   :  { %2062 = vst [vmem:[#allocation10 + $0x50] sm:$0xff] %v2046_v3  ;;  %v2034_v5 = vadd.f32 %v2015_v17, %v1808_v6  ;;  %v2017_v7 = vpop.f32.mrb[23].mxu0 }
 0x915   :  { %2063 = vst [vmem:[#allocation10 + $0x58] sm:$0xff] %v2047_v4  ;;  %v2035_v8 = vadd.f32 %v2017_v7, %v1809_v42 }
 0x916   :  { %v2050_v9 = vmax.f32 %v2034_v5, 0.0 }
 0x917   :  { %v2051_v24 = vmax.f32 %v2035_v8, 0.0 }
 0x918   :  { %2066 = vst [vmem:[#allocation10 + $0x70] sm:$0xff] %v2050_v9 }
 0x919   :  { %2067 = vst [vmem:[#allocation10 + $0x78] sm:$0xff] %v2051_v24 }
 0x91a   :  { %2976 = shalt.err (!%p2973_p8)
}
 0x91b   :  { %s2977_s27 = scalar_lea.hbm %s4032_s11, 2048 }
 0x91c   :  { %p2978_p9 = scmp.ne.s32.totalorder %s4032_s11, %s2977_s27  ;;  %p2981_p10 = scmp.lt.u32.totalorder %s2977_s27, %s4032_s11 }
 0x91e   :  { %p2983_p11 = pnand %p2981_p10, %p2978_p9 }
 0x920   :  { %2986 = shalt.err (!%p2983_p11)
}
 0x921   :  { %2079 = dma.vmem_to_hbm [thread:$0]  %s2074_s28, 2048, %s4032_s11, [#allocation4], %s3001_s2, %s3001_s2, %s3002_s29  }
 0x922   :  { %2993 = dma.done.wait [#allocation4], 2048  }
 0x923   :  { %2994 = vsyncadd [#allocation4], 4294965248 }
 0x924   :  { %2083 = vsyncpa [#allocation3], 1 }
 0x925   :  { %2084 = vsyncpa [#allocation6], 1 }
 0x926   :  { %2085 = vsyncpa [#allocation9], 1 }
 0x927   :  { %2086 = vsyncpa [#allocation4], 1 }

</bundles_post_ra>
